<compile_context>
chip_gen: v5e
topology: v5e:2x2
jax: 0.10.0
libtpu: 0.0.40
codegen_flags: <defaults>
</compile_context>

<pallas_src>
import functools

import jax
import jax.numpy as jnp
from jax.experimental import pallas as pl
from jax.experimental.pallas import tpu as pltpu

FILTER_CHANNELS = [8, 32, 32, 1]
GRID_RES = 4
GRID_DIM = 2
K0 = GRID_RES ** GRID_DIM          # first-layer conv kernel size == stride == 16
GROUP = 128 // K0                  # positions packed per 128-lane group == 8
LEAKY_SLOPE = 0.01                 # nn.LeakyReLU() default
MAX_TILE_N = 4096                  # grid cells per N-tile (multiple of 64)
MIN_GRID_STEPS = 4                 # keep >= 2 grid steps per TensorCore on v7x


# --------------------------------------------------------------------------- #
# Fused Pallas kernel: all MLP layers for one (batch, N-tile) block
# --------------------------------------------------------------------------- #
def _leaky_relu(x):
    return jnp.maximum(x, LEAKY_SLOPE * x)          # 2 VPU ops (review trim)


def _sigmoid(x):
    # exp on the EUP, divide moved to reciprocal; exact mode keeps 1e-5 accuracy.
    return pl.reciprocal(1.0 + jnp.exp(-x), approx=False)


def _fused_mlp_kernel(*refs, last_as_column):
    """refs = (x_ref, w0, b0, w1, b1, ..., w_last, b_last, o_ref, xt_ref).

    x_ref  : (1, C0, tile_g, 128) lane-dense feature block; lane j = r*K0 + k,
             position n = g*GROUP + r within the tile.
    w0     : (C1, C0*K0)  flattened layer-0 weight (128-deep contraction)
    wl     : (C_{l+1}, C_l) pointwise weights; w_last is a (C_{L-1}, 1) column
             when C_last == 1.
    bl     : (C_{l+1}, 1)
    o_ref  : (1, C_last, tile_g, GROUP) output block ((B, C, N//8, 8) HBM view)
    xt_ref : (C0, 128, tile_g) VMEM scratch holding the de-interleaved taps.
    """
    x_ref, o_ref, xt_ref = refs[0], refs[-2], refs[-1]
    wb = refs[1:-2]
    n_layers = len(wb) // 2
    c_in = x_ref.shape[1]
    tile_g = x_ref.shape[2]
    c_last = o_ref.shape[1]

    # ---- De-interleave (position, tap): one dense XLU transpose per channel. ----
    #   xt[ci, r*K0 + k, g] = feature[ci, tap k of position g*GROUP + r]
    for ci in range(c_in):
        xt_ref[ci] = x_ref[0, ci].T                     # (tile_g, 128) -> (128, tile_g)

    w0 = wb[0][...]                                     # (C1, C0*K0), VMEM resident
    b0 = wb[1][...]                                     # (C1, 1)

    y_blocks = []                                       # per residue r: (c_last, tile_g)
    for r in range(GROUP):
        # 128-deep MXU operand: aligned sublane slice + free leading-dim merge.
        xr = xt_ref[:, r * K0:(r + 1) * K0, :].reshape(c_in * K0, tile_g)

        # ---- Layer 0: single 128-deep matmul (grid pooling conv). ----
        h = jnp.dot(w0, xr, preferred_element_type=jnp.float32) + b0
        h = _leaky_relu(h)

        # ---- Hidden pointwise layers. ----
        for l in range(1, n_layers - 1):
            w, b = wb[2 * l][...], wb[2 * l + 1][...]
            h = _leaky_relu(jnp.dot(w, h, preferred_element_type=jnp.float32) + b)

        # ---- Last layer + sigmoid. ----
        w_last, b_last = wb[-2][...], wb[-1][...]
        if last_as_column:   # C_last == 1: VPU multiply + sublane reduce -> (1, tile_g)
            y = jnp.sum(h * w_last, axis=0, keepdims=True) + b_last
        else:
            y = jnp.dot(w_last, h, preferred_element_type=jnp.float32) + b_last
        y_blocks.append(_sigmoid(y))

    # ---- Restore PyTorch position order: out[.., g, r] = y_blocks[r][.., g]. ----
    for co in range(c_last):
        yg = jnp.concatenate([yb[co:co + 1, :] for yb in y_blocks], axis=0)  # (GROUP, tile_g)
        o_ref[0, co] = yg.T.astype(o_ref.dtype)                              # (tile_g, GROUP)


# --------------------------------------------------------------------------- #
# Wrapper: parameter repack (once) + fused pallas_call
# --------------------------------------------------------------------------- #
def prepare_params(params):
    """One-time repack of PyTorch-layout Conv1d params for the fused kernel."""
    n = len(params)
    prepped = []
    for l, (w, b) in enumerate(params):
        cout = w.shape[0]
        if l == 0:
            wp = w.reshape(cout, -1)                    # (C1, C0*K0), columns (ci, k)
        elif l == n - 1 and cout == 1:
            wp = jnp.transpose(w[:, :, 0], (1, 0))      # (C_{L-1}, 1) column
        else:
            wp = w[:, :, 0]                             # (Cout, Cin)
        prepped.append((wp, b.reshape(cout, 1)))
    return prepped


def _choose_tiling(batch, n):
    """Pick (tile_n, padded_n).

    Largest tile that (a) keeps >= MIN_GRID_STEPS grid steps (v7x 2-TC occupancy)
    and (b) wastes <= 1/8 of the work on padding; ragged N is padded rather than
    emitting one giant un-pipelined block.
    """
    n8 = -(-n // GROUP) * GROUP                         # grouped view needs N % 8 == 0
    min_tile = 8 * GROUP                                # 64: keeps tile_g % 8 == 0
    if n8 <= min_tile or (n8 <= MAX_TILE_N and batch >= MIN_GRID_STEPS):
        return n8, n8
    candidates = []
    t = MAX_TILE_N
    while t >= min_tile:
        candidates.append(t)
        t //= 2
    for t in candidates:
        n_tiles = -(-n8 // t)
        padded = n_tiles * t
        if batch * n_tiles >= MIN_GRID_STEPS and (padded - n8) * 8 <= n8:
            return t, padded
    t = candidates[-1]
    return t, -(-n8 // t) * t


def _const_index_map(ndim):
    return lambda b, j: (0,) * ndim


def mlp_forward(feature, prepped_params):
    """feature: (B, C0, L) f32 with L % K0 == 0. Returns (B, C_last, L // K0)."""
    B, c_in, L = feature.shape
    assert L % K0 == 0, (L, K0)
    assert len(prepped_params) >= 2
    N = L // K0
    c_last = prepped_params[-1][1].shape[0]

    tile_n, padded_n = _choose_tiling(B, N)
    if padded_n != N:
        feature = jnp.pad(feature, ((0, 0), (0, 0), (0, (padded_n - N) * K0)))

    # Metadata-only view: 8 positions x K0 taps per 128-lane row -> lane-dense,
    # contiguous HBM->VMEM copies (no 16->128 padding of the dominant stream).
    x3 = feature.reshape(B, c_in, padded_n // GROUP, GROUP * K0)
    tile_g = tile_n // GROUP
    grid = (B, padded_n // tile_n)

    in_specs = [pl.BlockSpec((1, c_in, tile_g, GROUP * K0),
                             lambda b, j: (b, 0, j, 0))]
    args = [x3]
    for wp, bp in prepped_params:                       # VMEM-resident params
        in_specs.append(pl.BlockSpec(wp.shape, _const_index_map(wp.ndim)))
        in_specs.append(pl.BlockSpec(bp.shape, _const_index_map(bp.ndim)))
        args += [wp, bp]

    kernel = functools.partial(_fused_mlp_kernel, last_as_column=(c_last == 1))
    out4 = pl.pallas_call(
        kernel,
        out_shape=jax.ShapeDtypeStruct((B, c_last, padded_n // GROUP, GROUP),
                                       jnp.float32),
        grid=grid,
        in_specs=in_specs,
        out_specs=pl.BlockSpec((1, c_last, tile_g, GROUP),
                               lambda b, j: (b, 0, j, 0)),
        scratch_shapes=[pltpu.VMEM((c_in, GROUP * K0, tile_g), jnp.float32)],
        compiler_params=pltpu.CompilerParams(
            dimension_semantics=("parallel", "parallel")),
    )(*args)

    out = out4.reshape(B, c_last, padded_n)
    if padded_n != N:
        out = out[:, :, :N]
    return out


# --------------------------------------------------------------------------- #
# Deterministic parameter init (same shapes / init scheme as nn.Conv1d)
# --------------------------------------------------------------------------- #
def init_params(key):
    params = []
    chans = FILTER_CHANNELS
    for l in range(len(chans) - 1):
        key, wk, bk = jax.random.split(key, 3)
        k = K0 if l == 0 else 1
        cin, cout = chans[l], chans[l + 1]
        bound = 1.0 / float(jnp.sqrt(cin * k))
        w = jax.random.uniform(wk, (cout, cin, k), jnp.float32, -bound, bound)
        b = jax.random.uniform(bk, (cout,), jnp.float32, -bound, bound)
        params.append((w, b))
    return params


# --------------------------------------------------------------------------- #
# Pure-JAX reference (lax.conv) to verify conv semantics of the kernel path
# --------------------------------------------------------------------------- #
def reference_forward(feature, params):
    y = feature
    n = len(params)
    for i, (w, b) in enumerate(params):
        stride = K0 if i == 0 else 1
        y = jax.lax.conv_general_dilated(
            y, w, window_strides=(stride,), padding="VALID",
            dimension_numbers=("NCH", "OIH", "NCH"))
        y = y + b[None, :, None]
        if i != n - 1:
            y = jnp.where(y >= 0.0, y, LEAKY_SLOPE * y)
    return 1.0 / (1.0 + jnp.exp(-y))


if __name__ == "__main__":
    key = jax.random.PRNGKey(0)
    pkey, xkey = jax.random.split(key)
    params = init_params(pkey)
    prepped = prepare_params(params)          # one-time repack, outside the jit

    fwd = jax.jit(mlp_forward)

    B = 2
    C0 = FILTER_CHANNELS[0]
    # Single-tile, ragged/padded, and multi-tile (pipelined grid) cases.
    for N in (64, 200, 2048):
        L = N * K0
        feature = jax.random.normal(jax.random.fold_in(xkey, N), (B, C0, L),
                                    dtype=jnp.float32)
        out = jax.block_until_ready(fwd(feature, prepped))
        ref = reference_forward(feature, params)
        assert out.shape == (B, FILTER_CHANNELS[-1], N), out.shape
        err = float(jnp.max(jnp.abs(out - ref)))
        assert err < 1e-5, err

    print("KERNEL_OK")
</pallas_src>

<mosaic_0001>
module attributes {stable_mosaic.version = 11 : i64} {
  func.func @_fused_mlp_kernel(%arg0: i32, %arg1: i32, %arg2: memref<1x8x8x128xf32, #tpu.memory_space<vmem>>, %arg3: memref<32x128xf32, #tpu.memory_space<vmem>>, %arg4: memref<32x1xf32, #tpu.memory_space<vmem>>, %arg5: memref<32x32xf32, #tpu.memory_space<vmem>>, %arg6: memref<32x1xf32, #tpu.memory_space<vmem>>, %arg7: memref<32x1xf32, #tpu.memory_space<vmem>>, %arg8: memref<1x1xf32, #tpu.memory_space<vmem>>, %arg9: memref<1x1x8x8xf32, #tpu.memory_space<vmem>>, %arg10: memref<8x128x8xf32, #tpu.memory_space<vmem>>) attributes {dimension_semantics = [#tpu.dimension_semantics<parallel>, #tpu.dimension_semantics<parallel>], iteration_bounds = array<i64: 2, 1>, scalar_prefetch = 0 : i64, scratch_operands = 1 : i64, tpu.core_type = #tpu.core_type<tc>, window_params = [{transform_indices = @transform_0, window_bounds = array<i64: 1, 8, 8, 128>}, {pipeline_mode = #tpu.pipeline_mode<synchronous>, transform_indices = @transform_1, window_bounds = array<i64: 32, 128>}, {pipeline_mode = #tpu.pipeline_mode<synchronous>, transform_indices = @transform_2, window_bounds = array<i64: 32, 1>}, {pipeline_mode = #tpu.pipeline_mode<synchronous>, transform_indices = @transform_3, window_bounds = array<i64: 32, 32>}, {pipeline_mode = #tpu.pipeline_mode<synchronous>, transform_indices = @transform_4, window_bounds = array<i64: 32, 1>}, {pipeline_mode = #tpu.pipeline_mode<synchronous>, transform_indices = @transform_5, window_bounds = array<i64: 32, 1>}, {pipeline_mode = #tpu.pipeline_mode<synchronous>, transform_indices = @transform_6, window_bounds = array<i64: 1, 1>}, {transform_indices = @transform_7, window_bounds = array<i64: 1, 1, 8, 8>}]} {
    %c0 = arith.constant 0 : index
    %c0_0 = arith.constant 0 : index
    %c0_1 = arith.constant 0 : index
    %c0_2 = arith.constant 0 : index
    %0 = vector.load %arg2[%c0, %c0_0, %c0_1, %c0_2] : memref<1x8x8x128xf32, #tpu.memory_space<vmem>>, vector<1x1x8x128xf32>
    %1 = vector.shape_cast %0 : vector<1x1x8x128xf32> to vector<8x128xf32>
    %2 = tpu.transpose %1, [1, 0] : vector<8x128xf32> -> vector<128x8xf32>
    %c0_3 = arith.constant 0 : index
    %c0_4 = arith.constant 0 : index
    %c0_5 = arith.constant 0 : index
    %3 = vector.load %arg10[%c0_3, %c0_4, %c0_5] : memref<8x128x8xf32, #tpu.memory_space<vmem>>, vector<1x128x8xf32>
    %4 = vector.shape_cast %3 : vector<1x128x8xf32> to vector<128x8xf32>
    %5 = vector.shape_cast %2 : vector<128x8xf32> to vector<1x128x8xf32>
    tpu.vector_store %arg10[%c0_3, %c0_4, %c0_5], %5 {strides = array<i32>} : memref<8x128x8xf32, #tpu.memory_space<vmem>>, vector<1x128x8xf32>,
    %c0_6 = arith.constant 0 : index
    %c1 = arith.constant 1 : index
    %c0_7 = arith.constant 0 : index
    %c0_8 = arith.constant 0 : index
    %6 = vector.load %arg2[%c0_6, %c1, %c0_7, %c0_8] : memref<1x8x8x128xf32, #tpu.memory_space<vmem>>, vector<1x1x8x128xf32>
    %7 = vector.shape_cast %6 : vector<1x1x8x128xf32> to vector<8x128xf32>
    %8 = tpu.transpose %7, [1, 0] : vector<8x128xf32> -> vector<128x8xf32>
    %c1_9 = arith.constant 1 : index
    %c0_10 = arith.constant 0 : index
    %c0_11 = arith.constant 0 : index
    %9 = vector.load %arg10[%c1_9, %c0_10, %c0_11] : memref<8x128x8xf32, #tpu.memory_space<vmem>>, vector<1x128x8xf32>
    %10 = vector.shape_cast %9 : vector<1x128x8xf32> to vector<128x8xf32>
    %11 = vector.shape_cast %8 : vector<128x8xf32> to vector<1x128x8xf32>
    tpu.vector_store %arg10[%c1_9, %c0_10, %c0_11], %11 {strides = array<i32>} : memref<8x128x8xf32, #tpu.memory_space<vmem>>, vector<1x128x8xf32>,
    %c0_12 = arith.constant 0 : index
    %c2 = arith.constant 2 : index
    %c0_13 = arith.constant 0 : index
    %c0_14 = arith.constant 0 : index
    %12 = vector.load %arg2[%c0_12, %c2, %c0_13, %c0_14] : memref<1x8x8x128xf32, #tpu.memory_space<vmem>>, vector<1x1x8x128xf32>
    %13 = vector.shape_cast %12 : vector<1x1x8x128xf32> to vector<8x128xf32>
    %14 = tpu.transpose %13, [1, 0] : vector<8x128xf32> -> vector<128x8xf32>
    %c2_15 = arith.constant 2 : index
    %c0_16 = arith.constant 0 : index
    %c0_17 = arith.constant 0 : index
    %15 = vector.load %arg10[%c2_15, %c0_16, %c0_17] : memref<8x128x8xf32, #tpu.memory_space<vmem>>, vector<1x128x8xf32>
    %16 = vector.shape_cast %15 : vector<1x128x8xf32> to vector<128x8xf32>
    %17 = vector.shape_cast %14 : vector<128x8xf32> to vector<1x128x8xf32>
    tpu.vector_store %arg10[%c2_15, %c0_16, %c0_17], %17 {strides = array<i32>} : memref<8x128x8xf32, #tpu.memory_space<vmem>>, vector<1x128x8xf32>,
    %c0_18 = arith.constant 0 : index
    %c3 = arith.constant 3 : index
    %c0_19 = arith.constant 0 : index
    %c0_20 = arith.constant 0 : index
    %18 = vector.load %arg2[%c0_18, %c3, %c0_19, %c0_20] : memref<1x8x8x128xf32, #tpu.memory_space<vmem>>, vector<1x1x8x128xf32>
    %19 = vector.shape_cast %18 : vector<1x1x8x128xf32> to vector<8x128xf32>
    %20 = tpu.transpose %19, [1, 0] : vector<8x128xf32> -> vector<128x8xf32>
    %c3_21 = arith.constant 3 : index
    %c0_22 = arith.constant 0 : index
    %c0_23 = arith.constant 0 : index
    %21 = vector.load %arg10[%c3_21, %c0_22, %c0_23] : memref<8x128x8xf32, #tpu.memory_space<vmem>>, vector<1x128x8xf32>
    %22 = vector.shape_cast %21 : vector<1x128x8xf32> to vector<128x8xf32>
    %23 = vector.shape_cast %20 : vector<128x8xf32> to vector<1x128x8xf32>
    tpu.vector_store %arg10[%c3_21, %c0_22, %c0_23], %23 {strides = array<i32>} : memref<8x128x8xf32, #tpu.memory_space<vmem>>, vector<1x128x8xf32>,
    %c0_24 = arith.constant 0 : index
    %c4 = arith.constant 4 : index
    %c0_25 = arith.constant 0 : index
    %c0_26 = arith.constant 0 : index
    %24 = vector.load %arg2[%c0_24, %c4, %c0_25, %c0_26] : memref<1x8x8x128xf32, #tpu.memory_space<vmem>>, vector<1x1x8x128xf32>
    %25 = vector.shape_cast %24 : vector<1x1x8x128xf32> to vector<8x128xf32>
    %26 = tpu.transpose %25, [1, 0] : vector<8x128xf32> -> vector<128x8xf32>
    %c4_27 = arith.constant 4 : index
    %c0_28 = arith.constant 0 : index
    %c0_29 = arith.constant 0 : index
    %27 = vector.load %arg10[%c4_27, %c0_28, %c0_29] : memref<8x128x8xf32, #tpu.memory_space<vmem>>, vector<1x128x8xf32>
    %28 = vector.shape_cast %27 : vector<1x128x8xf32> to vector<128x8xf32>
    %29 = vector.shape_cast %26 : vector<128x8xf32> to vector<1x128x8xf32>
    tpu.vector_store %arg10[%c4_27, %c0_28, %c0_29], %29 {strides = array<i32>} : memref<8x128x8xf32, #tpu.memory_space<vmem>>, vector<1x128x8xf32>,
    %c0_30 = arith.constant 0 : index
    %c5 = arith.constant 5 : index
    %c0_31 = arith.constant 0 : index
    %c0_32 = arith.constant 0 : index
    %30 = vector.load %arg2[%c0_30, %c5, %c0_31, %c0_32] : memref<1x8x8x128xf32, #tpu.memory_space<vmem>>, vector<1x1x8x128xf32>
    %31 = vector.shape_cast %30 : vector<1x1x8x128xf32> to vector<8x128xf32>
    %32 = tpu.transpose %31, [1, 0] : vector<8x128xf32> -> vector<128x8xf32>
    %c5_33 = arith.constant 5 : index
    %c0_34 = arith.constant 0 : index
    %c0_35 = arith.constant 0 : index
    %33 = vector.load %arg10[%c5_33, %c0_34, %c0_35] : memref<8x128x8xf32, #tpu.memory_space<vmem>>, vector<1x128x8xf32>
    %34 = vector.shape_cast %33 : vector<1x128x8xf32> to vector<128x8xf32>
    %35 = vector.shape_cast %32 : vector<128x8xf32> to vector<1x128x8xf32>
    tpu.vector_store %arg10[%c5_33, %c0_34, %c0_35], %35 {strides = array<i32>} : memref<8x128x8xf32, #tpu.memory_space<vmem>>, vector<1x128x8xf32>,
    %c0_36 = arith.constant 0 : index
    %c6 = arith.constant 6 : index
    %c0_37 = arith.constant 0 : index
    %c0_38 = arith.constant 0 : index
    %36 = vector.load %arg2[%c0_36, %c6, %c0_37, %c0_38] : memref<1x8x8x128xf32, #tpu.memory_space<vmem>>, vector<1x1x8x128xf32>
    %37 = vector.shape_cast %36 : vector<1x1x8x128xf32> to vector<8x128xf32>
    %38 = tpu.transpose %37, [1, 0] : vector<8x128xf32> -> vector<128x8xf32>
    %c6_39 = arith.constant 6 : index
    %c0_40 = arith.constant 0 : index
    %c0_41 = arith.constant 0 : index
    %39 = vector.load %arg10[%c6_39, %c0_40, %c0_41] : memref<8x128x8xf32, #tpu.memory_space<vmem>>, vector<1x128x8xf32>
    %40 = vector.shape_cast %39 : vector<1x128x8xf32> to vector<128x8xf32>
    %41 = vector.shape_cast %38 : vector<128x8xf32> to vector<1x128x8xf32>
    tpu.vector_store %arg10[%c6_39, %c0_40, %c0_41], %41 {strides = array<i32>} : memref<8x128x8xf32, #tpu.memory_space<vmem>>, vector<1x128x8xf32>,
    %c0_42 = arith.constant 0 : index
    %c7 = arith.constant 7 : index
    %c0_43 = arith.constant 0 : index
    %c0_44 = arith.constant 0 : index
    %42 = vector.load %arg2[%c0_42, %c7, %c0_43, %c0_44] : memref<1x8x8x128xf32, #tpu.memory_space<vmem>>, vector<1x1x8x128xf32>
    %43 = vector.shape_cast %42 : vector<1x1x8x128xf32> to vector<8x128xf32>
    %44 = tpu.transpose %43, [1, 0] : vector<8x128xf32> -> vector<128x8xf32>
    %c7_45 = arith.constant 7 : index
    %c0_46 = arith.constant 0 : index
    %c0_47 = arith.constant 0 : index
    %45 = vector.load %arg10[%c7_45, %c0_46, %c0_47] : memref<8x128x8xf32, #tpu.memory_space<vmem>>, vector<1x128x8xf32>
    %46 = vector.shape_cast %45 : vector<1x128x8xf32> to vector<128x8xf32>
    %47 = vector.shape_cast %44 : vector<128x8xf32> to vector<1x128x8xf32>
    tpu.vector_store %arg10[%c7_45, %c0_46, %c0_47], %47 {strides = array<i32>} : memref<8x128x8xf32, #tpu.memory_space<vmem>>, vector<1x128x8xf32>,
    %c0_48 = arith.constant 0 : index
    %c0_49 = arith.constant 0 : index
    %48 = vector.load %arg3[%c0_48, %c0_49] : memref<32x128xf32, #tpu.memory_space<vmem>>, vector<32x128xf32>
    %c0_50 = arith.constant 0 : index
    %c0_51 = arith.constant 0 : index
    %49 = vector.load %arg4[%c0_50, %c0_51] : memref<32x1xf32, #tpu.memory_space<vmem>>, vector<32x1xf32>
    %c0_52 = arith.constant 0 : index
    %c0_53 = arith.constant 0 : index
    %c0_54 = arith.constant 0 : index
    %50 = vector.load %arg10[%c0_52, %c0_53, %c0_54] : memref<8x128x8xf32, #tpu.memory_space<vmem>>, vector<8x16x8xf32>
    %51 = vector.shape_cast %50 : vector<8x16x8xf32> to vector<128x8xf32>
    %cst = arith.constant dense<0.000000e+00> : vector<32x8xf32>
    %52 = tpu.matmul %48, %51, %cst {dimension_numbers = #tpu.dot_dimension_numbers<[1], [0], [0], [1], [0, 0, 1, 1], [], []>} : vector<32x128xf32>, vector<128x8xf32>, vector<32x8xf32> -> vector<32x8xf32>
    %53 = vector.broadcast %49 : vector<32x1xf32> to vector<32x8xf32>
    %54 = arith.addf %52, %53 : vector<32x8xf32>
    %cst_55 = arith.constant 0.00999999977 : f32
    %55 = vector.broadcast %cst_55 : f32 to vector<32x8xf32>
    %56 = arith.mulf %55, %54 : vector<32x8xf32>
    %57 = arith.maximumf %54, %56 : vector<32x8xf32>
    %c0_56 = arith.constant 0 : index
    %c0_57 = arith.constant 0 : index
    %58 = vector.load %arg5[%c0_56, %c0_57] : memref<32x32xf32, #tpu.memory_space<vmem>>, vector<32x32xf32>
    %c0_58 = arith.constant 0 : index
    %c0_59 = arith.constant 0 : index
    %59 = vector.load %arg6[%c0_58, %c0_59] : memref<32x1xf32, #tpu.memory_space<vmem>>, vector<32x1xf32>
    %cst_60 = arith.constant dense<0.000000e+00> : vector<32x8xf32>
    %60 = tpu.matmul %58, %57, %cst_60 {dimension_numbers = #tpu.dot_dimension_numbers<[1], [0], [0], [1], [0, 0, 1, 1], [], []>} : vector<32x32xf32>, vector<32x8xf32>, vector<32x8xf32> -> vector<32x8xf32>
    %61 = vector.broadcast %59 : vector<32x1xf32> to vector<32x8xf32>
    %62 = arith.addf %60, %61 : vector<32x8xf32>
    %cst_61 = arith.constant 0.00999999977 : f32
    %63 = vector.broadcast %cst_61 : f32 to vector<32x8xf32>
    %64 = arith.mulf %63, %62 : vector<32x8xf32>
    %65 = arith.maximumf %62, %64 : vector<32x8xf32>
    %c0_62 = arith.constant 0 : index
    %c0_63 = arith.constant 0 : index
    %66 = vector.load %arg7[%c0_62, %c0_63] : memref<32x1xf32, #tpu.memory_space<vmem>>, vector<32x1xf32>
    %c0_64 = arith.constant 0 : index
    %c0_65 = arith.constant 0 : index
    %67 = vector.load %arg8[%c0_64, %c0_65] : memref<1x1xf32, #tpu.memory_space<vmem>>, vector<1x1xf32>
    %68 = vector.broadcast %66 : vector<32x1xf32> to vector<32x8xf32>
    %69 = arith.mulf %65, %68 : vector<32x8xf32>
    %cst_66 = arith.constant dense<0.000000e+00> : vector<8xf32>
    %70 = vector.multi_reduction <add>, %69, %cst_66 [0] : vector<32x8xf32> to vector<8xf32>
    %71 = vector.shape_cast %70 : vector<8xf32> to vector<1x8xf32>
    %72 = vector.broadcast %67 : vector<1x1xf32> to vector<1x8xf32>
    %73 = arith.addf %71, %72 : vector<1x8xf32>
    %cst_67 = arith.constant 0.000000e+00 : f32
    %74 = vector.broadcast %cst_67 : f32 to vector<1x8xf32>
    %75 = arith.subf %74, %73 : vector<1x8xf32>
    %76 = math.exp %75 : vector<1x8xf32>
    %cst_68 = arith.constant 1.000000e+00 : f32
    %77 = vector.broadcast %cst_68 : f32 to vector<1x8xf32>
    %78 = arith.addf %77, %76 : vector<1x8xf32>
    %79 = tpu.reciprocal %78 : vector<1x8xf32> -> vector<1x8xf32>
    %c0_69 = arith.constant 0 : index
    %c16 = arith.constant 16 : index
    %c0_70 = arith.constant 0 : index
    %80 = vector.load %arg10[%c0_69, %c16, %c0_70] : memref<8x128x8xf32, #tpu.memory_space<vmem>>, vector<8x16x8xf32>
    %81 = vector.shape_cast %80 : vector<8x16x8xf32> to vector<128x8xf32>
    %cst_71 = arith.constant dense<0.000000e+00> : vector<32x8xf32>
    %82 = tpu.matmul %48, %81, %cst_71 {dimension_numbers = #tpu.dot_dimension_numbers<[1], [0], [0], [1], [0, 0, 1, 1], [], []>} : vector<32x128xf32>, vector<128x8xf32>, vector<32x8xf32> -> vector<32x8xf32>
    %83 = vector.broadcast %49 : vector<32x1xf32> to vector<32x8xf32>
    %84 = arith.addf %82, %83 : vector<32x8xf32>
    %cst_72 = arith.constant 0.00999999977 : f32
    %85 = vector.broadcast %cst_72 : f32 to vector<32x8xf32>
    %86 = arith.mulf %85, %84 : vector<32x8xf32>
    %87 = arith.maximumf %84, %86 : vector<32x8xf32>
    %c0_73 = arith.constant 0 : index
    %c0_74 = arith.constant 0 : index
    %88 = vector.load %arg5[%c0_73, %c0_74] : memref<32x32xf32, #tpu.memory_space<vmem>>, vector<32x32xf32>
    %c0_75 = arith.constant 0 : index
    %c0_76 = arith.constant 0 : index
    %89 = vector.load %arg6[%c0_75, %c0_76] : memref<32x1xf32, #tpu.memory_space<vmem>>, vector<32x1xf32>
    %cst_77 = arith.constant dense<0.000000e+00> : vector<32x8xf32>
    %90 = tpu.matmul %88, %87, %cst_77 {dimension_numbers = #tpu.dot_dimension_numbers<[1], [0], [0], [1], [0, 0, 1, 1], [], []>} : vector<32x32xf32>, vector<32x8xf32>, vector<32x8xf32> -> vector<32x8xf32>
    %91 = vector.broadcast %89 : vector<32x1xf32> to vector<32x8xf32>
    %92 = arith.addf %90, %91 : vector<32x8xf32>
    %cst_78 = arith.constant 0.00999999977 : f32
    %93 = vector.broadcast %cst_78 : f32 to vector<32x8xf32>
    %94 = arith.mulf %93, %92 : vector<32x8xf32>
    %95 = arith.maximumf %92, %94 : vector<32x8xf32>
    %c0_79 = arith.constant 0 : index
    %c0_80 = arith.constant 0 : index
    %96 = vector.load %arg7[%c0_79, %c0_80] : memref<32x1xf32, #tpu.memory_space<vmem>>, vector<32x1xf32>
    %c0_81 = arith.constant 0 : index
    %c0_82 = arith.constant 0 : index
    %97 = vector.load %arg8[%c0_81, %c0_82] : memref<1x1xf32, #tpu.memory_space<vmem>>, vector<1x1xf32>
    %98 = vector.broadcast %96 : vector<32x1xf32> to vector<32x8xf32>
    %99 = arith.mulf %95, %98 : vector<32x8xf32>
    %cst_83 = arith.constant dense<0.000000e+00> : vector<8xf32>
    %100 = vector.multi_reduction <add>, %99, %cst_83 [0] : vector<32x8xf32> to vector<8xf32>
    %101 = vector.shape_cast %100 : vector<8xf32> to vector<1x8xf32>
    %102 = vector.broadcast %97 : vector<1x1xf32> to vector<1x8xf32>
    %103 = arith.addf %101, %102 : vector<1x8xf32>
    %cst_84 = arith.constant 0.000000e+00 : f32
    %104 = vector.broadcast %cst_84 : f32 to vector<1x8xf32>
    %105 = arith.subf %104, %103 : vector<1x8xf32>
    %106 = math.exp %105 : vector<1x8xf32>
    %cst_85 = arith.constant 1.000000e+00 : f32
    %107 = vector.broadcast %cst_85 : f32 to vector<1x8xf32>
    %108 = arith.addf %107, %106 : vector<1x8xf32>
    %109 = tpu.reciprocal %108 : vector<1x8xf32> -> vector<1x8xf32>
    %c0_86 = arith.constant 0 : index
    %c32 = arith.constant 32 : index
    %c0_87 = arith.constant 0 : index
    %110 = vector.load %arg10[%c0_86, %c32, %c0_87] : memref<8x128x8xf32, #tpu.memory_space<vmem>>, vector<8x16x8xf32>
    %111 = vector.shape_cast %110 : vector<8x16x8xf32> to vector<128x8xf32>
    %cst_88 = arith.constant dense<0.000000e+00> : vector<32x8xf32>
    %112 = tpu.matmul %48, %111, %cst_88 {dimension_numbers = #tpu.dot_dimension_numbers<[1], [0], [0], [1], [0, 0, 1, 1], [], []>} : vector<32x128xf32>, vector<128x8xf32>, vector<32x8xf32> -> vector<32x8xf32>
    %113 = vector.broadcast %49 : vector<32x1xf32> to vector<32x8xf32>
    %114 = arith.addf %112, %113 : vector<32x8xf32>
    %cst_89 = arith.constant 0.00999999977 : f32
    %115 = vector.broadcast %cst_89 : f32 to vector<32x8xf32>
    %116 = arith.mulf %115, %114 : vector<32x8xf32>
    %117 = arith.maximumf %114, %116 : vector<32x8xf32>
    %c0_90 = arith.constant 0 : index
    %c0_91 = arith.constant 0 : index
    %118 = vector.load %arg5[%c0_90, %c0_91] : memref<32x32xf32, #tpu.memory_space<vmem>>, vector<32x32xf32>
    %c0_92 = arith.constant 0 : index
    %c0_93 = arith.constant 0 : index
    %119 = vector.load %arg6[%c0_92, %c0_93] : memref<32x1xf32, #tpu.memory_space<vmem>>, vector<32x1xf32>
    %cst_94 = arith.constant dense<0.000000e+00> : vector<32x8xf32>
    %120 = tpu.matmul %118, %117, %cst_94 {dimension_numbers = #tpu.dot_dimension_numbers<[1], [0], [0], [1], [0, 0, 1, 1], [], []>} : vector<32x32xf32>, vector<32x8xf32>, vector<32x8xf32> -> vector<32x8xf32>
    %121 = vector.broadcast %119 : vector<32x1xf32> to vector<32x8xf32>
    %122 = arith.addf %120, %121 : vector<32x8xf32>
    %cst_95 = arith.constant 0.00999999977 : f32
    %123 = vector.broadcast %cst_95 : f32 to vector<32x8xf32>
    %124 = arith.mulf %123, %122 : vector<32x8xf32>
    %125 = arith.maximumf %122, %124 : vector<32x8xf32>
    %c0_96 = arith.constant 0 : index
    %c0_97 = arith.constant 0 : index
    %126 = vector.load %arg7[%c0_96, %c0_97] : memref<32x1xf32, #tpu.memory_space<vmem>>, vector<32x1xf32>
    %c0_98 = arith.constant 0 : index
    %c0_99 = arith.constant 0 : index
    %127 = vector.load %arg8[%c0_98, %c0_99] : memref<1x1xf32, #tpu.memory_space<vmem>>, vector<1x1xf32>
    %128 = vector.broadcast %126 : vector<32x1xf32> to vector<32x8xf32>
    %129 = arith.mulf %125, %128 : vector<32x8xf32>
    %cst_100 = arith.constant dense<0.000000e+00> : vector<8xf32>
    %130 = vector.multi_reduction <add>, %129, %cst_100 [0] : vector<32x8xf32> to vector<8xf32>
    %131 = vector.shape_cast %130 : vector<8xf32> to vector<1x8xf32>
    %132 = vector.broadcast %127 : vector<1x1xf32> to vector<1x8xf32>
    %133 = arith.addf %131, %132 : vector<1x8xf32>
    %cst_101 = arith.constant 0.000000e+00 : f32
    %134 = vector.broadcast %cst_101 : f32 to vector<1x8xf32>
    %135 = arith.subf %134, %133 : vector<1x8xf32>
    %136 = math.exp %135 : vector<1x8xf32>
    %cst_102 = arith.constant 1.000000e+00 : f32
    %137 = vector.broadcast %cst_102 : f32 to vector<1x8xf32>
    %138 = arith.addf %137, %136 : vector<1x8xf32>
    %139 = tpu.reciprocal %138 : vector<1x8xf32> -> vector<1x8xf32>
    %c0_103 = arith.constant 0 : index
    %c48 = arith.constant 48 : index
    %c0_104 = arith.constant 0 : index
    %140 = vector.load %arg10[%c0_103, %c48, %c0_104] : memref<8x128x8xf32, #tpu.memory_space<vmem>>, vector<8x16x8xf32>
    %141 = vector.shape_cast %140 : vector<8x16x8xf32> to vector<128x8xf32>
    %cst_105 = arith.constant dense<0.000000e+00> : vector<32x8xf32>
    %142 = tpu.matmul %48, %141, %cst_105 {dimension_numbers = #tpu.dot_dimension_numbers<[1], [0], [0], [1], [0, 0, 1, 1], [], []>} : vector<32x128xf32>, vector<128x8xf32>, vector<32x8xf32> -> vector<32x8xf32>
    %143 = vector.broadcast %49 : vector<32x1xf32> to vector<32x8xf32>
    %144 = arith.addf %142, %143 : vector<32x8xf32>
    %cst_106 = arith.constant 0.00999999977 : f32
    %145 = vector.broadcast %cst_106 : f32 to vector<32x8xf32>
    %146 = arith.mulf %145, %144 : vector<32x8xf32>
    %147 = arith.maximumf %144, %146 : vector<32x8xf32>
    %c0_107 = arith.constant 0 : index
    %c0_108 = arith.constant 0 : index
    %148 = vector.load %arg5[%c0_107, %c0_108] : memref<32x32xf32, #tpu.memory_space<vmem>>, vector<32x32xf32>
    %c0_109 = arith.constant 0 : index
    %c0_110 = arith.constant 0 : index
    %149 = vector.load %arg6[%c0_109, %c0_110] : memref<32x1xf32, #tpu.memory_space<vmem>>, vector<32x1xf32>
    %cst_111 = arith.constant dense<0.000000e+00> : vector<32x8xf32>
    %150 = tpu.matmul %148, %147, %cst_111 {dimension_numbers = #tpu.dot_dimension_numbers<[1], [0], [0], [1], [0, 0, 1, 1], [], []>} : vector<32x32xf32>, vector<32x8xf32>, vector<32x8xf32> -> vector<32x8xf32>
    %151 = vector.broadcast %149 : vector<32x1xf32> to vector<32x8xf32>
    %152 = arith.addf %150, %151 : vector<32x8xf32>
    %cst_112 = arith.constant 0.00999999977 : f32
    %153 = vector.broadcast %cst_112 : f32 to vector<32x8xf32>
    %154 = arith.mulf %153, %152 : vector<32x8xf32>
    %155 = arith.maximumf %152, %154 : vector<32x8xf32>
    %c0_113 = arith.constant 0 : index
    %c0_114 = arith.constant 0 : index
    %156 = vector.load %arg7[%c0_113, %c0_114] : memref<32x1xf32, #tpu.memory_space<vmem>>, vector<32x1xf32>
    %c0_115 = arith.constant 0 : index
    %c0_116 = arith.constant 0 : index
    %157 = vector.load %arg8[%c0_115, %c0_116] : memref<1x1xf32, #tpu.memory_space<vmem>>, vector<1x1xf32>
    %158 = vector.broadcast %156 : vector<32x1xf32> to vector<32x8xf32>
    %159 = arith.mulf %155, %158 : vector<32x8xf32>
    %cst_117 = arith.constant dense<0.000000e+00> : vector<8xf32>
    %160 = vector.multi_reduction <add>, %159, %cst_117 [0] : vector<32x8xf32> to vector<8xf32>
    %161 = vector.shape_cast %160 : vector<8xf32> to vector<1x8xf32>
    %162 = vector.broadcast %157 : vector<1x1xf32> to vector<1x8xf32>
    %163 = arith.addf %161, %162 : vector<1x8xf32>
    %cst_118 = arith.constant 0.000000e+00 : f32
    %164 = vector.broadcast %cst_118 : f32 to vector<1x8xf32>
    %165 = arith.subf %164, %163 : vector<1x8xf32>
    %166 = math.exp %165 : vector<1x8xf32>
    %cst_119 = arith.constant 1.000000e+00 : f32
    %167 = vector.broadcast %cst_119 : f32 to vector<1x8xf32>
    %168 = arith.addf %167, %166 : vector<1x8xf32>
    %169 = tpu.reciprocal %168 : vector<1x8xf32> -> vector<1x8xf32>
    %c0_120 = arith.constant 0 : index
    %c64 = arith.constant 64 : index
    %c0_121 = arith.constant 0 : index
    %170 = vector.load %arg10[%c0_120, %c64, %c0_121] : memref<8x128x8xf32, #tpu.memory_space<vmem>>, vector<8x16x8xf32>
    %171 = vector.shape_cast %170 : vector<8x16x8xf32> to vector<128x8xf32>
    %cst_122 = arith.constant dense<0.000000e+00> : vector<32x8xf32>
    %172 = tpu.matmul %48, %171, %cst_122 {dimension_numbers = #tpu.dot_dimension_numbers<[1], [0], [0], [1], [0, 0, 1, 1], [], []>} : vector<32x128xf32>, vector<128x8xf32>, vector<32x8xf32> -> vector<32x8xf32>
    %173 = vector.broadcast %49 : vector<32x1xf32> to vector<32x8xf32>
    %174 = arith.addf %172, %173 : vector<32x8xf32>
    %cst_123 = arith.constant 0.00999999977 : f32
    %175 = vector.broadcast %cst_123 : f32 to vector<32x8xf32>
    %176 = arith.mulf %175, %174 : vector<32x8xf32>
    %177 = arith.maximumf %174, %176 : vector<32x8xf32>
    %c0_124 = arith.constant 0 : index
    %c0_125 = arith.constant 0 : index
    %178 = vector.load %arg5[%c0_124, %c0_125] : memref<32x32xf32, #tpu.memory_space<vmem>>, vector<32x32xf32>
    %c0_126 = arith.constant 0 : index
    %c0_127 = arith.constant 0 : index
    %179 = vector.load %arg6[%c0_126, %c0_127] : memref<32x1xf32, #tpu.memory_space<vmem>>, vector<32x1xf32>
    %cst_128 = arith.constant dense<0.000000e+00> : vector<32x8xf32>
    %180 = tpu.matmul %178, %177, %cst_128 {dimension_numbers = #tpu.dot_dimension_numbers<[1], [0], [0], [1], [0, 0, 1, 1], [], []>} : vector<32x32xf32>, vector<32x8xf32>, vector<32x8xf32> -> vector<32x8xf32>
    %181 = vector.broadcast %179 : vector<32x1xf32> to vector<32x8xf32>
    %182 = arith.addf %180, %181 : vector<32x8xf32>
    %cst_129 = arith.constant 0.00999999977 : f32
    %183 = vector.broadcast %cst_129 : f32 to vector<32x8xf32>
    %184 = arith.mulf %183, %182 : vector<32x8xf32>
    %185 = arith.maximumf %182, %184 : vector<32x8xf32>
    %c0_130 = arith.constant 0 : index
    %c0_131 = arith.constant 0 : index
    %186 = vector.load %arg7[%c0_130, %c0_131] : memref<32x1xf32, #tpu.memory_space<vmem>>, vector<32x1xf32>
    %c0_132 = arith.constant 0 : index
    %c0_133 = arith.constant 0 : index
    %187 = vector.load %arg8[%c0_132, %c0_133] : memref<1x1xf32, #tpu.memory_space<vmem>>, vector<1x1xf32>
    %188 = vector.broadcast %186 : vector<32x1xf32> to vector<32x8xf32>
    %189 = arith.mulf %185, %188 : vector<32x8xf32>
    %cst_134 = arith.constant dense<0.000000e+00> : vector<8xf32>
    %190 = vector.multi_reduction <add>, %189, %cst_134 [0] : vector<32x8xf32> to vector<8xf32>
    %191 = vector.shape_cast %190 : vector<8xf32> to vector<1x8xf32>
    %192 = vector.broadcast %187 : vector<1x1xf32> to vector<1x8xf32>
    %193 = arith.addf %191, %192 : vector<1x8xf32>
    %cst_135 = arith.constant 0.000000e+00 : f32
    %194 = vector.broadcast %cst_135 : f32 to vector<1x8xf32>
    %195 = arith.subf %194, %193 : vector<1x8xf32>
    %196 = math.exp %195 : vector<1x8xf32>
    %cst_136 = arith.constant 1.000000e+00 : f32
    %197 = vector.broadcast %cst_136 : f32 to vector<1x8xf32>
    %198 = arith.addf %197, %196 : vector<1x8xf32>
    %199 = tpu.reciprocal %198 : vector<1x8xf32> -> vector<1x8xf32>
    %c0_137 = arith.constant 0 : index
    %c80 = arith.constant 80 : index
    %c0_138 = arith.constant 0 : index
    %200 = vector.load %arg10[%c0_137, %c80, %c0_138] : memref<8x128x8xf32, #tpu.memory_space<vmem>>, vector<8x16x8xf32>
    %201 = vector.shape_cast %200 : vector<8x16x8xf32> to vector<128x8xf32>
    %cst_139 = arith.constant dense<0.000000e+00> : vector<32x8xf32>
    %202 = tpu.matmul %48, %201, %cst_139 {dimension_numbers = #tpu.dot_dimension_numbers<[1], [0], [0], [1], [0, 0, 1, 1], [], []>} : vector<32x128xf32>, vector<128x8xf32>, vector<32x8xf32> -> vector<32x8xf32>
    %203 = vector.broadcast %49 : vector<32x1xf32> to vector<32x8xf32>
    %204 = arith.addf %202, %203 : vector<32x8xf32>
    %cst_140 = arith.constant 0.00999999977 : f32
    %205 = vector.broadcast %cst_140 : f32 to vector<32x8xf32>
    %206 = arith.mulf %205, %204 : vector<32x8xf32>
    %207 = arith.maximumf %204, %206 : vector<32x8xf32>
    %c0_141 = arith.constant 0 : index
    %c0_142 = arith.constant 0 : index
    %208 = vector.load %arg5[%c0_141, %c0_142] : memref<32x32xf32, #tpu.memory_space<vmem>>, vector<32x32xf32>
    %c0_143 = arith.constant 0 : index
    %c0_144 = arith.constant 0 : index
    %209 = vector.load %arg6[%c0_143, %c0_144] : memref<32x1xf32, #tpu.memory_space<vmem>>, vector<32x1xf32>
    %cst_145 = arith.constant dense<0.000000e+00> : vector<32x8xf32>
    %210 = tpu.matmul %208, %207, %cst_145 {dimension_numbers = #tpu.dot_dimension_numbers<[1], [0], [0], [1], [0, 0, 1, 1], [], []>} : vector<32x32xf32>, vector<32x8xf32>, vector<32x8xf32> -> vector<32x8xf32>
    %211 = vector.broadcast %209 : vector<32x1xf32> to vector<32x8xf32>
    %212 = arith.addf %210, %211 : vector<32x8xf32>
    %cst_146 = arith.constant 0.00999999977 : f32
    %213 = vector.broadcast %cst_146 : f32 to vector<32x8xf32>
    %214 = arith.mulf %213, %212 : vector<32x8xf32>
    %215 = arith.maximumf %212, %214 : vector<32x8xf32>
    %c0_147 = arith.constant 0 : index
    %c0_148 = arith.constant 0 : index
    %216 = vector.load %arg7[%c0_147, %c0_148] : memref<32x1xf32, #tpu.memory_space<vmem>>, vector<32x1xf32>
    %c0_149 = arith.constant 0 : index
    %c0_150 = arith.constant 0 : index
    %217 = vector.load %arg8[%c0_149, %c0_150] : memref<1x1xf32, #tpu.memory_space<vmem>>, vector<1x1xf32>
    %218 = vector.broadcast %216 : vector<32x1xf32> to vector<32x8xf32>
    %219 = arith.mulf %215, %218 : vector<32x8xf32>
    %cst_151 = arith.constant dense<0.000000e+00> : vector<8xf32>
    %220 = vector.multi_reduction <add>, %219, %cst_151 [0] : vector<32x8xf32> to vector<8xf32>
    %221 = vector.shape_cast %220 : vector<8xf32> to vector<1x8xf32>
    %222 = vector.broadcast %217 : vector<1x1xf32> to vector<1x8xf32>
    %223 = arith.addf %221, %222 : vector<1x8xf32>
    %cst_152 = arith.constant 0.000000e+00 : f32
    %224 = vector.broadcast %cst_152 : f32 to vector<1x8xf32>
    %225 = arith.subf %224, %223 : vector<1x8xf32>
    %226 = math.exp %225 : vector<1x8xf32>
    %cst_153 = arith.constant 1.000000e+00 : f32
    %227 = vector.broadcast %cst_153 : f32 to vector<1x8xf32>
    %228 = arith.addf %227, %226 : vector<1x8xf32>
    %229 = tpu.reciprocal %228 : vector<1x8xf32> -> vector<1x8xf32>
    %c0_154 = arith.constant 0 : index
    %c96 = arith.constant 96 : index
    %c0_155 = arith.constant 0 : index
    %230 = vector.load %arg10[%c0_154, %c96, %c0_155] : memref<8x128x8xf32, #tpu.memory_space<vmem>>, vector<8x16x8xf32>
    %231 = vector.shape_cast %230 : vector<8x16x8xf32> to vector<128x8xf32>
    %cst_156 = arith.constant dense<0.000000e+00> : vector<32x8xf32>
    %232 = tpu.matmul %48, %231, %cst_156 {dimension_numbers = #tpu.dot_dimension_numbers<[1], [0], [0], [1], [0, 0, 1, 1], [], []>} : vector<32x128xf32>, vector<128x8xf32>, vector<32x8xf32> -> vector<32x8xf32>
    %233 = vector.broadcast %49 : vector<32x1xf32> to vector<32x8xf32>
    %234 = arith.addf %232, %233 : vector<32x8xf32>
    %cst_157 = arith.constant 0.00999999977 : f32
    %235 = vector.broadcast %cst_157 : f32 to vector<32x8xf32>
    %236 = arith.mulf %235, %234 : vector<32x8xf32>
    %237 = arith.maximumf %234, %236 : vector<32x8xf32>
    %c0_158 = arith.constant 0 : index
    %c0_159 = arith.constant 0 : index
    %238 = vector.load %arg5[%c0_158, %c0_159] : memref<32x32xf32, #tpu.memory_space<vmem>>, vector<32x32xf32>
    %c0_160 = arith.constant 0 : index
    %c0_161 = arith.constant 0 : index
    %239 = vector.load %arg6[%c0_160, %c0_161] : memref<32x1xf32, #tpu.memory_space<vmem>>, vector<32x1xf32>
    %cst_162 = arith.constant dense<0.000000e+00> : vector<32x8xf32>
    %240 = tpu.matmul %238, %237, %cst_162 {dimension_numbers = #tpu.dot_dimension_numbers<[1], [0], [0], [1], [0, 0, 1, 1], [], []>} : vector<32x32xf32>, vector<32x8xf32>, vector<32x8xf32> -> vector<32x8xf32>
    %241 = vector.broadcast %239 : vector<32x1xf32> to vector<32x8xf32>
    %242 = arith.addf %240, %241 : vector<32x8xf32>
    %cst_163 = arith.constant 0.00999999977 : f32
    %243 = vector.broadcast %cst_163 : f32 to vector<32x8xf32>
    %244 = arith.mulf %243, %242 : vector<32x8xf32>
    %245 = arith.maximumf %242, %244 : vector<32x8xf32>
    %c0_164 = arith.constant 0 : index
    %c0_165 = arith.constant 0 : index
    %246 = vector.load %arg7[%c0_164, %c0_165] : memref<32x1xf32, #tpu.memory_space<vmem>>, vector<32x1xf32>
    %c0_166 = arith.constant 0 : index
    %c0_167 = arith.constant 0 : index
    %247 = vector.load %arg8[%c0_166, %c0_167] : memref<1x1xf32, #tpu.memory_space<vmem>>, vector<1x1xf32>
    %248 = vector.broadcast %246 : vector<32x1xf32> to vector<32x8xf32>
    %249 = arith.mulf %245, %248 : vector<32x8xf32>
    %cst_168 = arith.constant dense<0.000000e+00> : vector<8xf32>
    %250 = vector.multi_reduction <add>, %249, %cst_168 [0] : vector<32x8xf32> to vector<8xf32>
    %251 = vector.shape_cast %250 : vector<8xf32> to vector<1x8xf32>
    %252 = vector.broadcast %247 : vector<1x1xf32> to vector<1x8xf32>
    %253 = arith.addf %251, %252 : vector<1x8xf32>
    %cst_169 = arith.constant 0.000000e+00 : f32
    %254 = vector.broadcast %cst_169 : f32 to vector<1x8xf32>
    %255 = arith.subf %254, %253 : vector<1x8xf32>
    %256 = math.exp %255 : vector<1x8xf32>
    %cst_170 = arith.constant 1.000000e+00 : f32
    %257 = vector.broadcast %cst_170 : f32 to vector<1x8xf32>
    %258 = arith.addf %257, %256 : vector<1x8xf32>
    %259 = tpu.reciprocal %258 : vector<1x8xf32> -> vector<1x8xf32>
    %c0_171 = arith.constant 0 : index
    %c112 = arith.constant 112 : index
    %c0_172 = arith.constant 0 : index
    %260 = vector.load %arg10[%c0_171, %c112, %c0_172] : memref<8x128x8xf32, #tpu.memory_space<vmem>>, vector<8x16x8xf32>
    %261 = vector.shape_cast %260 : vector<8x16x8xf32> to vector<128x8xf32>
    %cst_173 = arith.constant dense<0.000000e+00> : vector<32x8xf32>
    %262 = tpu.matmul %48, %261, %cst_173 {dimension_numbers = #tpu.dot_dimension_numbers<[1], [0], [0], [1], [0, 0, 1, 1], [], []>} : vector<32x128xf32>, vector<128x8xf32>, vector<32x8xf32> -> vector<32x8xf32>
    %263 = vector.broadcast %49 : vector<32x1xf32> to vector<32x8xf32>
    %264 = arith.addf %262, %263 : vector<32x8xf32>
    %cst_174 = arith.constant 0.00999999977 : f32
    %265 = vector.broadcast %cst_174 : f32 to vector<32x8xf32>
    %266 = arith.mulf %265, %264 : vector<32x8xf32>
    %267 = arith.maximumf %264, %266 : vector<32x8xf32>
    %c0_175 = arith.constant 0 : index
    %c0_176 = arith.constant 0 : index
    %268 = vector.load %arg5[%c0_175, %c0_176] : memref<32x32xf32, #tpu.memory_space<vmem>>, vector<32x32xf32>
    %c0_177 = arith.constant 0 : index
    %c0_178 = arith.constant 0 : index
    %269 = vector.load %arg6[%c0_177, %c0_178] : memref<32x1xf32, #tpu.memory_space<vmem>>, vector<32x1xf32>
    %cst_179 = arith.constant dense<0.000000e+00> : vector<32x8xf32>
    %270 = tpu.matmul %268, %267, %cst_179 {dimension_numbers = #tpu.dot_dimension_numbers<[1], [0], [0], [1], [0, 0, 1, 1], [], []>} : vector<32x32xf32>, vector<32x8xf32>, vector<32x8xf32> -> vector<32x8xf32>
    %271 = vector.broadcast %269 : vector<32x1xf32> to vector<32x8xf32>
    %272 = arith.addf %270, %271 : vector<32x8xf32>
    %cst_180 = arith.constant 0.00999999977 : f32
    %273 = vector.broadcast %cst_180 : f32 to vector<32x8xf32>
    %274 = arith.mulf %273, %272 : vector<32x8xf32>
    %275 = arith.maximumf %272, %274 : vector<32x8xf32>
    %c0_181 = arith.constant 0 : index
    %c0_182 = arith.constant 0 : index
    %276 = vector.load %arg7[%c0_181, %c0_182] : memref<32x1xf32, #tpu.memory_space<vmem>>, vector<32x1xf32>
    %c0_183 = arith.constant 0 : index
    %c0_184 = arith.constant 0 : index
    %277 = vector.load %arg8[%c0_183, %c0_184] : memref<1x1xf32, #tpu.memory_space<vmem>>, vector<1x1xf32>
    %278 = vector.broadcast %276 : vector<32x1xf32> to vector<32x8xf32>
    %279 = arith.mulf %275, %278 : vector<32x8xf32>
    %cst_185 = arith.constant dense<0.000000e+00> : vector<8xf32>
    %280 = vector.multi_reduction <add>, %279, %cst_185 [0] : vector<32x8xf32> to vector<8xf32>
    %281 = vector.shape_cast %280 : vector<8xf32> to vector<1x8xf32>
    %282 = vector.broadcast %277 : vector<1x1xf32> to vector<1x8xf32>
    %283 = arith.addf %281, %282 : vector<1x8xf32>
    %cst_186 = arith.constant 0.000000e+00 : f32
    %284 = vector.broadcast %cst_186 : f32 to vector<1x8xf32>
    %285 = arith.subf %284, %283 : vector<1x8xf32>
    %286 = math.exp %285 : vector<1x8xf32>
    %cst_187 = arith.constant 1.000000e+00 : f32
    %287 = vector.broadcast %cst_187 : f32 to vector<1x8xf32>
    %288 = arith.addf %287, %286 : vector<1x8xf32>
    %289 = tpu.reciprocal %288 : vector<1x8xf32> -> vector<1x8xf32>
    %290 = tpu.concatenate %79, %109, %139, %169, %199, %229, %259, %289 in 0 : vector<1x8xf32>, vector<1x8xf32>, vector<1x8xf32>, vector<1x8xf32>, vector<1x8xf32>, vector<1x8xf32>, vector<1x8xf32>, vector<1x8xf32> -> vector<8x8xf32>
    %291 = tpu.transpose %290, [1, 0] : vector<8x8xf32> -> vector<8x8xf32>
    %c0_188 = arith.constant 0 : index
    %c0_189 = arith.constant 0 : index
    %c0_190 = arith.constant 0 : index
    %c0_191 = arith.constant 0 : index
    %292 = vector.load %arg9[%c0_188, %c0_189, %c0_190, %c0_191] : memref<1x1x8x8xf32, #tpu.memory_space<vmem>>, vector<1x1x8x8xf32>
    %293 = vector.shape_cast %292 : vector<1x1x8x8xf32> to vector<8x8xf32>
    %294 = vector.shape_cast %291 : vector<8x8xf32> to vector<1x1x8x8xf32>
    tpu.vector_store %arg9[%c0_188, %c0_189, %c0_190, %c0_191], %294 {strides = array<i32>} : memref<1x1x8x8xf32, #tpu.memory_space<vmem>>, vector<1x1x8x8xf32>,
    return
  }
  func.func @transform_0(%arg0: i32, %arg1: i32) -> (i32, i32, i32, i32) {
    %c0_i32 = arith.constant 0 : i32
    %c0_i32_0 = arith.constant 0 : i32
    %c0_i32_1 = arith.constant 0 : i32
    return %arg0, %c0_i32, %arg1, %c0_i32_0 : i32, i32, i32, i32
  }
  func.func @transform_1(%arg0: i32, %arg1: i32) -> (i32, i32) {
    %c0_i32 = arith.constant 0 : i32
    %c0_i32_0 = arith.constant 0 : i32
    %c0_i32_1 = arith.constant 0 : i32
    return %c0_i32, %c0_i32_0 : i32, i32
  }
  func.func @transform_2(%arg0: i32, %arg1: i32) -> (i32, i32) {
    %c0_i32 = arith.constant 0 : i32
    %c0_i32_0 = arith.constant 0 : i32
    %c0_i32_1 = arith.constant 0 : i32
    return %c0_i32, %c0_i32_0 : i32, i32
  }
  func.func @transform_3(%arg0: i32, %arg1: i32) -> (i32, i32) {
    %c0_i32 = arith.constant 0 : i32
    %c0_i32_0 = arith.constant 0 : i32
    %c0_i32_1 = arith.constant 0 : i32
    return %c0_i32, %c0_i32_0 : i32, i32
  }
  func.func @transform_4(%arg0: i32, %arg1: i32) -> (i32, i32) {
    %c0_i32 = arith.constant 0 : i32
    %c0_i32_0 = arith.constant 0 : i32
    %c0_i32_1 = arith.constant 0 : i32
    return %c0_i32, %c0_i32_0 : i32, i32
  }
  func.func @transform_5(%arg0: i32, %arg1: i32) -> (i32, i32) {
    %c0_i32 = arith.constant 0 : i32
    %c0_i32_0 = arith.constant 0 : i32
    %c0_i32_1 = arith.constant 0 : i32
    return %c0_i32, %c0_i32_0 : i32, i32
  }
  func.func @transform_6(%arg0: i32, %arg1: i32) -> (i32, i32) {
    %c0_i32 = arith.constant 0 : i32
    %c0_i32_0 = arith.constant 0 : i32
    %c0_i32_1 = arith.constant 0 : i32
    return %c0_i32, %c0_i32_0 : i32, i32
  }
  func.func @transform_7(%arg0: i32, %arg1: i32) -> (i32, i32, i32, i32) {
    %c0_i32 = arith.constant 0 : i32
    %c0_i32_0 = arith.constant 0 : i32
    %c0_i32_1 = arith.constant 0 : i32
    return %arg0, %c0_i32, %arg1, %c0_i32_0 : i32, i32, i32, i32
  }
}

</mosaic_0001>

<bundles_post_ra>
// kernel: mlp_forward.1
= control target key start
LH: loop header
LB: loop body
LE: loop exit
PB: predicated region body
PF: predicated region fallthrough
CT: control target
= control target key end

     0   :  { %s2148_s26 = smov 0   ;;  %s2150_s27 = smov 0   ;;  %s2754_s0 = inlined_call_operand.vmem [shape: f32[2,8,8,128], index: 0, kind: input, shape index: {}]   ;;  %s2755_s1 = inlined_call_operand.vmem [shape: f32[32,128], index: 1, kind: input, shape index: {}]   ;;  %s2756_s2 = inlined_call_operand.vmem [shape: f32[32,1], index: 2, kind: input, shape index: {}]   ;;  %s2757_s3 = inlined_call_operand.vmem [shape: f32[32,32], index: 3, kind: input, shape index: {}]   ;;  %s2758_s4 = inlined_call_operand.vmem [shape: f32[32,1], index: 4, kind: input, shape index: {}]   ;;  %s2759_s5 = inlined_call_operand.vmem [shape: f32[32,1], index: 5, kind: input, shape index: {}]   ;;  %s2760_s6 = inlined_call_operand.<no memory space> [shape: f32[1,1], index: 6, kind: input, shape index: {}]   ;;  %s2761_s7 = inlined_call_operand.vmem [shape: f32[2,1,8,8], index: 7, kind: output, shape index: {}]  }
   0x1   :  { %v12_v0 = vstv %s2760_s6  ;;  %s2152_s28 = smov 0  }
   0x2   :  { %13 = vst [vmem:[#allocation3] sm:$0x1] %v12_v0 }
   0x3 LB: > { %s31_s6 = sadd.s32 1, %s2098_s27  ;;  %p1953_p0 = scmp.ge.s32.totalorder %s2102_s28, 1  ;;  %s2102_s28 = sphi %s2152_s28, %s19_s28   ;;  %s2098_s27 = sphi %s2150_s27, %s2765_s27   ;;  %s2094_s26 = sphi %s2148_s26, %s2764_s26  }
   0x4   : > { %p33_p1 = scmp.ge.s32.totalorder %s31_s6, 2  ;;  %p258_p2 = scmp.lt.s32.totalorder %s2102_s28, 3 }
   0x6   : > { %s2767_s6 = smov (%p33_p1, %s31_s6), 0  ;;  %p259_p3 = pnand %p1953_p0, %p258_p2 }
   0x7   : > { %p295_p4 = scmp.lt.s32.totalorder (!%p259_p3), %s2094_s26, 1 }
   0x8   : > { %262 = sbr.rel (%p259_p3) target bundleno = 1264 (0x4f0), region = 48 }
   0xd   : > { %s2769_s26 = smov (!%p295_p4, %s2094_s26), 1  ;;  %vm343_vm0 = vcmask 64512   ;;  %vm826_vm1 = vcmask 261120   ;;  %vm1825_vm8 = vcmask 1040384   ;;  %vm1827_vm14 = vcmask 1041408  }
   0xe   : > { %s1998_s29 = sshll.u32 %s2769_s26, 6  ;;  %s1956_s10 = sshll.u32 %s2769_s26, 3 }
   0xf   : > { %s2172_s9 = scalar_lea.vmem %s2754_s0, %s1998_s29  ;;  %s309_s13 = scalar_lea.vmem %s2761_s7, %s1956_s10 }
  0x10   : > { %v1963_v1 = vld [vmem:[%s2172_s9 + $0x38] sm:$0xff]  ;;  %v1961_v2 = vld [vmem:[%s2172_s9 + $0x28] sm:$0xff]  ;;  %v1962_v4 = vld [vmem:[%s2172_s9 + $0x30] sm:$0xff] }
  0x11   : > { %v1959_v3 = vld [vmem:[%s2172_s9 + $0x18] sm:$0xff]  ;;  %668 = vxpose.xlu0.b32.start.end [1/1] (short) %v1963_v1, 128  ;;  %566 = vxpose.xlu1.b32.start.end [1/1] (short) %v1961_v2, 128  ;;  %v1960_v5 = vld [vmem:[%s2172_s9 + $0x20] sm:$0xff]  ;;  %v1958_v8 = vld [vmem:[%s2172_s9 + $0x10] sm:$0xff] }
  0x12   : > { %464 = vxpose.xlu2.b32.start.end [1/1] (short) %v1959_v3, 128  ;;  %v1957_v38 = vld [vmem:[%s2172_s9 + $0x8] sm:$0xff]  ;;  %v310_v39 = vld [vmem:[%s2172_s9] sm:$0xff] }
  0x91   : > { %617 = vxpose.xlu0.b32.start.end [1/1] (short) %v1962_v4, 128  ;;  %515 = vxpose.xlu1.b32.start.end [1/1] (short) %v1960_v5, 128 }
  0x92   : > { %413 = vxpose.xlu2.b32.start.end [1/1] (short) %v1958_v8, 128 }
  0xab   : > { %v480_v29 = vpop.trf.xlu2 }
  0xac   : > { %497 = vst.msk [vmem:[#allocation2 + $0x180] sm:$0xff] %vm343_vm0, %v480_v29 }
  0xb3   : > { %v481_v32 = vpop.trf.xlu2  ;;  %v731_v8 = vld [vmem:[#allocation2 + $0x180] sm:$0xff] }
  0xb4   : > { %498 = vst.msk [vmem:[#allocation2 + $0x188] sm:$0xff] %vm343_vm0, %v481_v32 }
  0xb5   : > { %v684_v6 = vpop.trf.xlu0  ;;  %v582_v7 = vpop.trf.xlu1 }
  0xb6   : > { %701 = vst.msk [vmem:[#allocation2 + $0x380] sm:$0xff] %vm343_vm0, %v684_v6 }
  0xb7   : > { %599 = vst.msk [vmem:[#allocation2 + $0x280] sm:$0xff] %vm343_vm0, %v582_v7 }
  0xbb   : > { %v482_v35 = vpop.trf.xlu2  ;;  %v732_v7 = vld [vmem:[#allocation2 + $0x188] sm:$0xff] }
  0xbc   : > { %499 = vst.msk [vmem:[#allocation2 + $0x190] sm:$0xff] %vm343_vm0, %v482_v35 }
  0xbd   : > { %v685_v9 = vpop.trf.xlu0  ;;  %v583_v10 = vpop.trf.xlu1  ;;  %v739_v14 = vld [vmem:[#allocation2 + $0x380] sm:$0xff] }
  0xbe   : > { %702 = vst.msk [vmem:[#allocation2 + $0x388] sm:$0xff] %vm343_vm0, %v685_v9  ;;  %v735_v1 = vld [vmem:[#allocation2 + $0x280] sm:$0xff] }
  0xbf   : > { %600 = vst.msk [vmem:[#allocation2 + $0x288] sm:$0xff] %vm343_vm0, %v583_v10 }
  0xc3   : > { %v483_v40 = vpop.trf.xlu2 }
  0xc4   : > { %500 = vst.msk [vmem:[#allocation2 + $0x198] sm:$0xff] %vm343_vm0, %v483_v40 }
  0xc5   : > { %v686_v11 = vpop.trf.xlu0  ;;  %v740_v12 = vld [vmem:[#allocation2 + $0x388] sm:$0xff]  ;;  %v584_v13 = vpop.trf.xlu1 }
  0xc6   : > { %703 = vst.msk [vmem:[#allocation2 + $0x390] sm:$0xff] %vm343_vm0, %v686_v11  ;;  %761 = vmatpush.msra.mxu0 %v740_v12  ;;  %v736_v0 = vld [vmem:[#allocation2 + $0x288] sm:$0xff] }
  0xc7   : > { %601 = vst.msk [vmem:[#allocation2 + $0x290] sm:$0xff] %vm343_vm0, %v584_v13 }
  0xc8   : > { %762 = vmatpush.msra.mxu0 %v739_v14 }
  0xcb   : > { %v484_v43 = vpop.trf.xlu2 }
  0xcc   : > { %501 = vst.msk [vmem:[#allocation2 + $0x1a0] sm:$0xff] %vm343_vm0, %v484_v43 }
  0xcd   : > { %v687_v15 = vpop.trf.xlu0  ;;  %v585_v16 = vpop.trf.xlu1  ;;  %v957_v20 = vld [vmem:[#allocation2 + $0x390] sm:$0xff] }
  0xce   : > { %704 = vst.msk [vmem:[#allocation2 + $0x398] sm:$0xff] %vm343_vm0, %v687_v15  ;;  %v953_v15 = vld [vmem:[#allocation2 + $0x290] sm:$0xff] }
  0xcf   : > { %602 = vst.msk [vmem:[#allocation2 + $0x298] sm:$0xff] %vm343_vm0, %v585_v16 }
  0xd3   : > { %v485_v46 = vpop.trf.xlu2 }
  0xd4   : > { %502 = vst.msk [vmem:[#allocation2 + $0x1a8] sm:$0xff] %vm343_vm0, %v485_v46  ;;  %v2104_v46 = vmov 0  }
  0xd5   : > { %v688_v17 = vpop.trf.xlu0  ;;  %v958_v18 = vld [vmem:[#allocation2 + $0x398] sm:$0xff]  ;;  %v586_v19 = vpop.trf.xlu1 }
  0xd6   : > { %705 = vst.msk [vmem:[#allocation2 + $0x3a0] sm:$0xff] %vm343_vm0, %v688_v17  ;;  %959 = vmatpush.msra.mxu2 %v958_v18  ;;  %v954_v14 = vld [vmem:[#allocation2 + $0x298] sm:$0xff] }
  0xd7   : > { %603 = vst.msk [vmem:[#allocation2 + $0x2a0] sm:$0xff] %vm343_vm0, %v586_v19 }
  0xd8   : > { %960 = vmatpush.msra.mxu2 %v957_v20 }
  0xdb   : > { %v486_v49 = vpop.trf.xlu2 }
  0xdc   : > { %503 = vst.msk [vmem:[#allocation2 + $0x1b0] sm:$0xff] %vm343_vm0, %v486_v49 }
  0xdd   : > { %v689_v21 = vpop.trf.xlu0  ;;  %v587_v22 = vpop.trf.xlu1 }
  0xde   : > { %706 = vst.msk [vmem:[#allocation2 + $0x3a8] sm:$0xff] %vm343_vm0, %v689_v21  ;;  %v950_v21 = vld [vmem:[#allocation2 + $0x198] sm:$0xff] }
  0xdf   : > { %604 = vst.msk [vmem:[#allocation2 + $0x2a8] sm:$0xff] %vm343_vm0, %v587_v22  ;;  %v949_v22 = vld [vmem:[#allocation2 + $0x190] sm:$0xff] }
  0xe3   : > { %v487_v52 = vpop.trf.xlu2 }
  0xe4   : > { %504 = vst.msk [vmem:[#allocation2 + $0x1b8] sm:$0xff] %vm343_vm0, %v487_v52 }
  0xe5   : > { %v690_v23 = vpop.trf.xlu0  ;;  %v588_v24 = vpop.trf.xlu1 }
  0xe6   : > { %707 = vst.msk [vmem:[#allocation2 + $0x3b0] sm:$0xff] %vm343_vm0, %v690_v23 }
  0xe7   : > { %605 = vst.msk [vmem:[#allocation2 + $0x2b0] sm:$0xff] %vm343_vm0, %v588_v24 }
  0xeb   : > { %v488_v55 = vpop.trf.xlu2 }
  0xec   : > { %505 = vst.msk [vmem:[#allocation2 + $0x1c0] sm:$0xff] %vm343_vm0, %v488_v55  ;;  %v802_v55 = vld [vmem:[%s2758_s4] sm:$0xff] }
  0xed   : > { %v691_v25 = vpop.trf.xlu0  ;;  %v589_v26 = vpop.trf.xlu1 }
  0xee   : > { %708 = vst.msk [vmem:[#allocation2 + $0x3b8] sm:$0xff] %vm343_vm0, %v691_v25 }
  0xef   : > { %606 = vst.msk [vmem:[#allocation2 + $0x2b8] sm:$0xff] %vm343_vm0, %v589_v26 }
  0xf3   : > { %v489_v58 = vpop.trf.xlu2 }
  0xf4   : > { %506 = vst.msk [vmem:[#allocation2 + $0x1c8] sm:$0xff] %vm343_vm0, %v489_v58  ;;  %2045 = vset.pattern.permute.xlu2 %v2104_v46 }
  0xf5   : > { %v692_v27 = vpop.trf.xlu0  ;;  %v590_v28 = vpop.trf.xlu1 }
  0xf6   : > { %709 = vst.msk [vmem:[#allocation2 + $0x3c0] sm:$0xff] %vm343_vm0, %v692_v27 }
  0xf7   : > { %607 = vst.msk [vmem:[#allocation2 + $0x2c0] sm:$0xff] %vm343_vm0, %v590_v28 }
  0xfb   : > { %v490_v62 = vpop.trf.xlu2 }
  0xfc   : > { %507 = vst.msk [vmem:[#allocation2 + $0x1d0] sm:$0xff] %vm343_vm0, %v490_v62 }
  0xfd   : > { %v693_v30 = vpop.trf.xlu0  ;;  %v591_v31 = vpop.trf.xlu1 }
  0xfe   : > { %710 = vst.msk [vmem:[#allocation2 + $0x3c8] sm:$0xff] %vm343_vm0, %v693_v30 }
  0xff   : > { %608 = vst.msk [vmem:[#allocation2 + $0x2c8] sm:$0xff] %vm343_vm0, %v591_v31 }
 0x103   : > { %v491_v5 = vpop.trf.xlu2 }
 0x104   : > { %508 = vst.msk [vmem:[#allocation2 + $0x1d8] sm:$0xff] %vm343_vm0, %v491_v5  ;;  %v805_v5 = vld [vmem:[%s2758_s4 + $0x18] sm:$0xff] }
 0x105   : > { %v694_v33 = vpop.trf.xlu0  ;;  %v592_v34 = vpop.trf.xlu1 }
 0x106   : > { %711 = vst.msk [vmem:[#allocation2 + $0x3d0] sm:$0xff] %vm343_vm0, %v694_v33 }
 0x107   : > { %609 = vst.msk [vmem:[#allocation2 + $0x2d0] sm:$0xff] %vm343_vm0, %v592_v34 }
 0x10b   : > { %v492_v12 = vpop.trf.xlu2 }
 0x10c   : > { %509 = vst.msk [vmem:[#allocation2 + $0x1e0] sm:$0xff] %vm343_vm0, %v492_v12  ;;  %v876_v12 = vld [vmem:[%s2759_s5] sm:$0xff] }
 0x10d   : > { %v695_v36 = vpop.trf.xlu0  ;;  %v593_v37 = vpop.trf.xlu1 }
 0x10e   : > { %712 = vst.msk [vmem:[#allocation2 + $0x3d8] sm:$0xff] %vm343_vm0, %v695_v36 }
 0x10f   : > { %610 = vst.msk [vmem:[#allocation2 + $0x2d8] sm:$0xff] %vm343_vm0, %v593_v37 }
 0x111   : > { %362 = vxpose.xlu0.b32.start.end [1/1] (short) %v1957_v38, 128  ;;  %311 = vxpose.xlu1.b32.start.end [1/1] (short) %v310_v39, 128 }
 0x113   : > { %v493_v19 = vpop.trf.xlu2 }
 0x114   : > { %510 = vst.msk [vmem:[#allocation2 + $0x1e8] sm:$0xff] %vm343_vm0, %v493_v19 }
 0x115   : > { %v696_v41 = vpop.trf.xlu0  ;;  %v594_v42 = vpop.trf.xlu1 }
 0x116   : > { %713 = vst.msk [vmem:[#allocation2 + $0x3e0] sm:$0xff] %vm343_vm0, %v696_v41 }
 0x117   : > { %611 = vst.msk [vmem:[#allocation2 + $0x2e0] sm:$0xff] %vm343_vm0, %v594_v42 }
 0x11b   : > { %v494_v25 = vpop.trf.xlu2 }
 0x11c   : > { %511 = vst.msk [vmem:[#allocation2 + $0x1f0] sm:$0xff] %vm343_vm0, %v494_v25 }
 0x11d   : > { %v697_v44 = vpop.trf.xlu0  ;;  %v595_v45 = vpop.trf.xlu1 }
 0x11e   : > { %714 = vst.msk [vmem:[#allocation2 + $0x3e8] sm:$0xff] %vm343_vm0, %v697_v44  ;;  %v724_v44 = vld [vmem:[%s2756_s2 + $0x18] sm:$0xff] }
 0x11f   : > { %612 = vst.msk [vmem:[#allocation2 + $0x2e8] sm:$0xff] %vm343_vm0, %v595_v45 }
 0x123   : > { %v495_v28 = vpop.trf.xlu2 }
 0x124   : > { %512 = vst.msk [vmem:[#allocation2 + $0x1f8] sm:$0xff] %vm343_vm0, %v495_v28 }
 0x125   : > { %v698_v47 = vpop.trf.xlu0  ;;  %v596_v48 = vpop.trf.xlu1 }
 0x126   : > { %715 = vst.msk [vmem:[#allocation2 + $0x3f0] sm:$0xff] %vm343_vm0, %v698_v47 }
 0x127   : > { %613 = vst.msk [vmem:[#allocation2 + $0x2f0] sm:$0xff] %vm343_vm0, %v596_v48 }
 0x12b   : > { %v429_v31 = vpop.trf.xlu2 }
 0x12c   : > { %446 = vst.msk [vmem:[#allocation2 + $0x100] sm:$0xff] %vm343_vm0, %v429_v31 }
 0x12d   : > { %v699_v50 = vpop.trf.xlu0  ;;  %v597_v51 = vpop.trf.xlu1 }
 0x12e   : > { %716 = vst.msk [vmem:[#allocation2 + $0x3f8] sm:$0xff] %vm343_vm0, %v699_v50 }
 0x12f   : > { %614 = vst.msk [vmem:[#allocation2 + $0x2f8] sm:$0xff] %vm343_vm0, %v597_v51  ;;  %v721_v51 = vld [vmem:[%s2756_s2] sm:$0xff] }
 0x133   : > { %v430_v34 = vpop.trf.xlu2  ;;  %v729_v50 = vld [vmem:[#allocation2 + $0x100] sm:$0xff] }
 0x134   : > { %447 = vst.msk [vmem:[#allocation2 + $0x108] sm:$0xff] %vm343_vm0, %v430_v34 }
 0x135   : > { %v633_v53 = vpop.trf.xlu0  ;;  %v531_v54 = vpop.trf.xlu1 }
 0x136   : > { %650 = vst.msk [vmem:[#allocation2 + $0x300] sm:$0xff] %vm343_vm0, %v633_v53 }
 0x137   : > { %548 = vst.msk [vmem:[#allocation2 + $0x200] sm:$0xff] %vm343_vm0, %v531_v54 }
 0x13b   : > { %v431_v37 = vpop.trf.xlu2  ;;  %v730_v45 = vld [vmem:[#allocation2 + $0x108] sm:$0xff] }
 0x13c   : > { %448 = vst.msk [vmem:[#allocation2 + $0x110] sm:$0xff] %vm343_vm0, %v431_v37  ;;  %v1202_v37 = vld [vmem:[#allocation2 + $0x1b8] sm:$0xff] }
 0x13d   : > { %v634_v56 = vpop.trf.xlu0  ;;  %v532_v57 = vpop.trf.xlu1  ;;  %v737_v63 = vld [vmem:[#allocation2 + $0x300] sm:$0xff] }
 0x13e   : > { %651 = vst.msk [vmem:[#allocation2 + $0x308] sm:$0xff] %vm343_vm0, %v634_v56  ;;  %v733_v6 = vld [vmem:[#allocation2 + $0x200] sm:$0xff] }
 0x13f   : > { %549 = vst.msk [vmem:[#allocation2 + $0x208] sm:$0xff] %vm343_vm0, %v532_v57 }
 0x143   : > { %v432_v40 = vpop.trf.xlu2 }
 0x144   : > { %449 = vst.msk [vmem:[#allocation2 + $0x118] sm:$0xff] %vm343_vm0, %v432_v40  ;;  %v1201_v40 = vld [vmem:[#allocation2 + $0x1b0] sm:$0xff] }
 0x145   : > { %v635_v59 = vpop.trf.xlu0  ;;  %v738_v60 = vld [vmem:[#allocation2 + $0x308] sm:$0xff]  ;;  %v533_v61 = vpop.trf.xlu1 }
 0x146   : > { %652 = vst.msk [vmem:[#allocation2 + $0x310] sm:$0xff] %vm343_vm0, %v635_v59  ;;  %763 = vmatpush.msra.mxu0 %v738_v60  ;;  %v734_v2 = vld [vmem:[#allocation2 + $0x208] sm:$0xff] }
 0x147   : > { %550 = vst.msk [vmem:[#allocation2 + $0x210] sm:$0xff] %vm343_vm0, %v533_v61  ;;  %v803_v60 = vld [vmem:[%s2758_s4 + $0x8] sm:$0xff]  ;;  %v947_v61 = vld [vmem:[#allocation2 + $0x110] sm:$0xff] }
 0x148   : > { %764 = vmatpush.msra.mxu0 %v737_v63 }
 0x14a   : > { %765 = vmatpush.msra.mxu0 %v736_v0 }
 0x14b   : > { %v433_v43 = vpop.trf.xlu2  ;;  %v948_v59 = vld [vmem:[#allocation2 + $0x118] sm:$0xff] }
 0x14c   : > { %766 = vmatpush.msra.mxu0 %v735_v1  ;;  %450 = vst.msk [vmem:[#allocation2 + $0x120] sm:$0xff] %vm343_vm0, %v433_v43  ;;  %v804_v1 = vld [vmem:[%s2758_s4 + $0x10] sm:$0xff]  ;;  %v722_v43 = vld [vmem:[%s2756_s2 + $0x8] sm:$0xff] }
 0x14d   : > { %v636_v3 = vpop.trf.xlu0  ;;  %v534_v4 = vpop.trf.xlu1  ;;  %v955_v13 = vld [vmem:[#allocation2 + $0x310] sm:$0xff] }
 0x14e   : > { %653 = vst.msk [vmem:[#allocation2 + $0x318] sm:$0xff] %vm343_vm0, %v636_v3  ;;  %767 = vmatpush.msra.mxu0 %v734_v2  ;;  %v951_v20 = vld [vmem:[#allocation2 + $0x210] sm:$0xff] }
 0x14f   : > { %551 = vst.msk [vmem:[#allocation2 + $0x218] sm:$0xff] %vm343_vm0, %v534_v4 }
 0x150   : > { %768 = vmatpush.msra.mxu0 %v733_v6 }
 0x152   : > { %769 = vmatpush.msra.mxu0 %v732_v7 }
 0x153   : > { %v434_v49 = vpop.trf.xlu2 }
 0x154   : > { %770 = vmatpush.msra.mxu0 %v731_v8  ;;  %451 = vst.msk [vmem:[#allocation2 + $0x128] sm:$0xff] %vm343_vm0, %v434_v49 }
 0x155   : > { %v637_v9 = vpop.trf.xlu0  ;;  %v956_v10 = vld [vmem:[#allocation2 + $0x318] sm:$0xff]  ;;  %v535_v11 = vpop.trf.xlu1 }
 0x156   : > { %654 = vst.msk [vmem:[#allocation2 + $0x320] sm:$0xff] %vm343_vm0, %v637_v9  ;;  %961 = vmatpush.msra.mxu2 %v956_v10  ;;  %v952_v16 = vld [vmem:[#allocation2 + $0x218] sm:$0xff]  ;;  %771 = vmatpush.msra.mxu0 %v730_v45 }
 0x157   : > { %552 = vst.msk [vmem:[#allocation2 + $0x220] sm:$0xff] %vm343_vm0, %v535_v11  ;;  %v879_v45 = vld [vmem:[%s2759_s5 + $0x18] sm:$0xff] }
 0x158   : > { %962 = vmatpush.msra.mxu2 %v955_v13  ;;  %772 = vmatpush.msra.mxu0 %v729_v50  ;;  %v880_v50 = vld [vmem:[#allocation3] sm:$0x1] }
 0x15a   : > { %963 = vmatpush.msra.mxu2 %v954_v14  ;;  %v2303_v14 = vld [vmem:[%s2755_s1] sm:$0xff] }
 0x15b   : > { %v435_v54 = vpop.trf.xlu2 }
 0x15c   : > { %964 = vmatpush.msra.mxu2 %v953_v15  ;;  %452 = vst.msk [vmem:[#allocation2 + $0x130] sm:$0xff] %vm343_vm0, %v435_v54  ;;  %v1210_v15 = vld [vmem:[#allocation2 + $0x3b8] sm:$0xff]  ;;  %v723_v54 = vld [vmem:[%s2756_s2 + $0x10] sm:$0xff] }
 0x15d   : > { %v638_v17 = vpop.trf.xlu0  ;;  %v536_v18 = vpop.trf.xlu1 }
 0x15e   : > { %655 = vst.msk [vmem:[#allocation2 + $0x328] sm:$0xff] %vm343_vm0, %v638_v17  ;;  %965 = vmatpush.msra.mxu2 %v952_v16 }
 0x15f   : > { %553 = vst.msk [vmem:[#allocation2 + $0x228] sm:$0xff] %vm343_vm0, %v536_v18  ;;  %v1209_v18 = vld [vmem:[#allocation2 + $0x3b0] sm:$0xff] }
 0x160   : > { %966 = vmatpush.msra.mxu2 %v951_v20 }
 0x162   : > { %967 = vmatpush.msra.mxu2 %v950_v21  ;;  %v877_v21 = vld [vmem:[%s2759_s5 + $0x8] sm:$0xff] }
 0x163   : > { %v436_v58 = vpop.trf.xlu2 }
 0x164   : > { %968 = vmatpush.msra.mxu2 %v949_v22  ;;  %2047 = vset.pattern.permute.xlu1 %v2104_v46  ;;  %453 = vst.msk [vmem:[#allocation2 + $0x138] sm:$0xff] %vm343_vm0, %v436_v58 }
 0x165   : > { %v639_v23 = vpop.trf.xlu0  ;;  %v537_v24 = vpop.trf.xlu1 }
 0x166   : > { %656 = vst.msk [vmem:[#allocation2 + $0x330] sm:$0xff] %vm343_vm0, %v639_v23  ;;  %969 = vmatpush.msra.mxu2 %v948_v59  ;;  %v2315_v23 = vld [vmem:[%s2755_s1 + $0x8] sm:$0xff] }
 0x167   : > { %554 = vst.msk [vmem:[#allocation2 + $0x230] sm:$0xff] %vm343_vm0, %v537_v24  ;;  %v1206_v24 = vld [vmem:[#allocation2 + $0x2b8] sm:$0xff] }
 0x168   : > { %970 = vmatpush.msra.mxu2 %v947_v61 }
 0x16b   : > { %v437_v0 = vpop.trf.xlu2 }
 0x16c   : > { %454 = vst.msk [vmem:[#allocation2 + $0x140] sm:$0xff] %vm343_vm0, %v437_v0  ;;  %v1461_v0 = vld [vmem:[#allocation2 + $0x3d0] sm:$0xff] }
 0x16d   : > { %v640_v26 = vpop.trf.xlu0  ;;  %v538_v27 = vpop.trf.xlu1  ;;  %v1207_v22 = vld [vmem:[#allocation2 + $0x330] sm:$0xff] }
 0x16e   : > { %657 = vst.msk [vmem:[#allocation2 + $0x338] sm:$0xff] %vm343_vm0, %v640_v26  ;;  %v1203_v34 = vld [vmem:[#allocation2 + $0x230] sm:$0xff] }
 0x16f   : > { %555 = vst.msk [vmem:[#allocation2 + $0x238] sm:$0xff] %vm343_vm0, %v538_v27 }
 0x173   : > { %758 = vperm.xlu2 %2045, %v724_v44   ;;  %v438_v4 = vpop.trf.xlu2  ;;  %v1199_v44 = vld [vmem:[#allocation2 + $0x130] sm:$0xff] }
 0x174   : > { %455 = vst.msk [vmem:[#allocation2 + $0x148] sm:$0xff] %vm343_vm0, %v438_v4  ;;  %v1458_v4 = vld [vmem:[#allocation2 + $0x2d8] sm:$0xff] }
 0x175   : > { %v641_v29 = vpop.trf.xlu0  ;;  %v539_v30 = vpop.trf.xlu1  ;;  %v1208_v20 = vld [vmem:[#allocation2 + $0x338] sm:$0xff] }
 0x176   : > { %658 = vst.msk [vmem:[#allocation2 + $0x340] sm:$0xff] %vm343_vm0, %v641_v29  ;;  %v1205_v29 = vld [vmem:[#allocation2 + $0x2b0] sm:$0xff] }
 0x177   : > { %556 = vst.msk [vmem:[#allocation2 + $0x240] sm:$0xff] %vm343_vm0, %v539_v30 }
 0x178   : > { %2046 = vset.pattern.permute.xlu0 %v2104_v46  ;;  %v2343_v46 = vld [vmem:[%s2755_s1 + $0x18] sm:$0xff] }
 0x17b   : > { %743 = vperm.xlu2 %2045, %v721_v51   ;;  %v439_v9 = vpop.trf.xlu2 }
 0x17c   : > { %456 = vst.msk [vmem:[#allocation2 + $0x150] sm:$0xff] %vm343_vm0, %v439_v9 }
 0x17d   : > { %v642_v32 = vpop.trf.xlu0  ;;  %v540_v33 = vpop.trf.xlu1 }
 0x17e   : > { %659 = vst.msk [vmem:[#allocation2 + $0x348] sm:$0xff] %vm343_vm0, %v642_v32  ;;  %v1204_v32 = vld [vmem:[#allocation2 + $0x238] sm:$0xff] }
 0x17f   : > { %557 = vst.msk [vmem:[#allocation2 + $0x248] sm:$0xff] %vm343_vm0, %v540_v33 }
 0x183   : > { %808 = vperm.xlu2 %2045, %v802_v55   ;;  %v440_v19 = vpop.trf.xlu2 }
 0x184   : > { %457 = vst.msk [vmem:[#allocation2 + $0x158] sm:$0xff] %vm343_vm0, %v440_v19 }
 0x185   : > { %v643_v35 = vpop.trf.xlu0  ;;  %v541_v36 = vpop.trf.xlu1 }
 0x186   : > { %660 = vst.msk [vmem:[#allocation2 + $0x350] sm:$0xff] %vm343_vm0, %v643_v35  ;;  %v878_v35 = vld [vmem:[%s2759_s5 + $0x10] sm:$0xff] }
 0x187   : > { %558 = vst.msk [vmem:[#allocation2 + $0x250] sm:$0xff] %vm343_vm0, %v541_v36  ;;  %v2327_v36 = vld [vmem:[%s2755_s1 + $0x10] sm:$0xff] }
 0x18b   : > { %813 = vperm.xlu2 %2045, %v803_v60   ;;  %v441_v30 = vpop.trf.xlu2 }
 0x18c   : > { %458 = vst.msk [vmem:[#allocation2 + $0x160] sm:$0xff] %vm343_vm0, %v441_v30  ;;  %v2388_v30 = vld [vmem:[#allocation2 + $0x2f8] sm:$0xff] }
 0x18d   : > { %v644_v38 = vpop.trf.xlu0  ;;  %v542_v39 = vpop.trf.xlu1 }
 0x18e   : > { %661 = vst.msk [vmem:[#allocation2 + $0x358] sm:$0xff] %vm343_vm0, %v644_v38 }
 0x18f   : > { %559 = vst.msk [vmem:[#allocation2 + $0x258] sm:$0xff] %vm343_vm0, %v542_v39 }
 0x193   : > { %818 = vperm.xlu2 %2045, %v804_v1  }
 0x195   : > { %v645_v41 = vpop.trf.xlu0  ;;  %v543_v42 = vpop.trf.xlu1  ;;  %v1460_v1 = vld [vmem:[#allocation2 + $0x358] sm:$0xff] }
 0x196   : > { %662 = vst.msk [vmem:[#allocation2 + $0x360] sm:$0xff] %vm343_vm0, %v645_v41  ;;  %v1200_v41 = vld [vmem:[#allocation2 + $0x138] sm:$0xff] }
 0x197   : > { %560 = vst.msk [vmem:[#allocation2 + $0x260] sm:$0xff] %vm343_vm0, %v543_v42  ;;  %v442_v42 = vpop.trf.xlu2 }
 0x198   : > { %459 = vst.msk [vmem:[#allocation2 + $0x168] sm:$0xff] %vm343_vm0, %v442_v42 }
 0x19b   : > { %823 = vperm.xlu2 %2045, %v805_v5  }
 0x19d   : > { %v646_v47 = vpop.trf.xlu0  ;;  %v544_v48 = vpop.trf.xlu1 }
 0x19e   : > { %663 = vst.msk [vmem:[#allocation2 + $0x368] sm:$0xff] %vm343_vm0, %v646_v47 }
 0x19f   : > { %561 = vst.msk [vmem:[#allocation2 + $0x268] sm:$0xff] %vm343_vm0, %v544_v48  ;;  %v443_v49 = vpop.trf.xlu2 }
 0x1a0   : > { %460 = vst.msk [vmem:[#allocation2 + $0x170] sm:$0xff] %vm343_vm0, %v443_v49 }
 0x1a3   : > { %883 = vperm.xlu2 %2045, %v876_v12   ;;  %v1453_v12 = vld [vmem:[#allocation2 + $0x1d0] sm:$0xff] }
 0x1a5   : > { %v647_v52 = vpop.trf.xlu0  ;;  %v545_v53 = vpop.trf.xlu1 }
 0x1a6   : > { %664 = vst.msk [vmem:[#allocation2 + $0x370] sm:$0xff] %vm343_vm0, %v647_v52 }
 0x1a7   : > { %562 = vst.msk [vmem:[#allocation2 + $0x270] sm:$0xff] %vm343_vm0, %v545_v53  ;;  %v444_v53 = vpop.trf.xlu2 }
 0x1a8   : > { %461 = vst.msk [vmem:[#allocation2 + $0x178] sm:$0xff] %vm343_vm0, %v444_v53 }
 0x1ab   : > { %888 = vperm.xlu2 %2045, %v877_v21  }
 0x1ad   : > { %v648_v56 = vpop.trf.xlu0  ;;  %v546_v57 = vpop.trf.xlu1 }
 0x1ae   : > { %665 = vst.msk [vmem:[#allocation2 + $0x378] sm:$0xff] %vm343_vm0, %v648_v56 }
 0x1af   : > { %563 = vst.msk [vmem:[#allocation2 + $0x278] sm:$0xff] %vm343_vm0, %v546_v57 }
 0x1b3   : > { %893 = vperm.xlu2 %2045, %v878_v35  }
 0x1b5   : > { %v378_v62 = vpop.trf.xlu0  ;;  %v327_v63 = vpop.trf.xlu1 }
 0x1b6   : > { %395 = vst.msk [vmem:[#allocation2 + $0x80] sm:$0xff] %vm343_vm0, %v378_v62  ;;  %v1462_v62 = vld [vmem:[#allocation2 + $0x3d8] sm:$0xff] }
 0x1b7   : > { %344 = vst.msk [vmem:[#allocation2] sm:$0xff] %vm343_vm0, %v327_v63 }
 0x1bb   : > { %898 = vperm.xlu2 %2045, %v879_v45  }
 0x1bd   : > { %v379_v2 = vpop.trf.xlu0  ;;  %v328_v3 = vpop.trf.xlu1  ;;  %v727_v10 = vld [vmem:[#allocation2 + $0x80] sm:$0xff] }
 0x1be   : > { %396 = vst.msk [vmem:[#allocation2 + $0x88] sm:$0xff] %vm343_vm0, %v379_v2  ;;  %v725_v13 = vld [vmem:[#allocation2] sm:$0xff]  ;;  %v1459_v2 = vld [vmem:[#allocation2 + $0x350] sm:$0xff] }
 0x1bf   : > { %345 = vst.msk [vmem:[#allocation2 + $0x8] sm:$0xff] %vm343_vm0, %v328_v3 }
 0x1c3   : > { %920 = vperm.xlu2 %2045, %v880_v50  }
 0x1c5   : > { %v380_v6 = vpop.trf.xlu0  ;;  %v728_v7 = vld [vmem:[#allocation2 + $0x88] sm:$0xff]  ;;  %v329_v8 = vpop.trf.xlu1 }
 0x1c6   : > { %397 = vst.msk [vmem:[#allocation2 + $0x90] sm:$0xff] %vm343_vm0, %v380_v6  ;;  %773 = vmatpush.msra.mxu0 %v728_v7  ;;  %v726_v11 = vld [vmem:[#allocation2 + $0x8] sm:$0xff]  ;;  %v1457_v6 = vld [vmem:[#allocation2 + $0x2d0] sm:$0xff]  ;;  %v1456_v7 = vld [vmem:[#allocation2 + $0x258] sm:$0xff] }
 0x1c7   : > { %346 = vst.msk [vmem:[#allocation2 + $0x10] sm:$0xff] %vm343_vm0, %v329_v8  ;;  %v1455_v8 = vld [vmem:[#allocation2 + $0x250] sm:$0xff] }
 0x1c8   : > { %774 = vmatpush.msra.mxu0 %v727_v10  ;;  %v1454_v10 = vld [vmem:[#allocation2 + $0x1d8] sm:$0xff] }
 0x1ca   : > { %775 = vmatpush.msra.mxu0 %v726_v11 }
 0x1cc   : > { %776 = vmatpush.msra.mxu0 %v725_v13  ;;  %v1452_v13 = vld [vmem:[#allocation2 + $0x158] sm:$0xff] }
 0x1cd   : > { %v381_v16 = vpop.trf.xlu0  ;;  %v330_v17 = vpop.trf.xlu1  ;;  %777 = vmatmul.f32.vlgmr.msra.gmra.mxu0 %v2303_v14  ;;  %v945_v27 = vld [vmem:[#allocation2 + $0x90] sm:$0xff] }
 0x1ce   : > { %1211 = vmatpush.msrb.mxu0 %v1210_v15  ;;  %398 = vst.msk [vmem:[#allocation2 + $0x98] sm:$0xff] %vm343_vm0, %v381_v16  ;;  %v943_v33 = vld [vmem:[#allocation2 + $0x10] sm:$0xff]  ;;  %v2433_v50 = vpop.permute.xlu2 %758 }
 0x1cf   : > { %347 = vst.msk [vmem:[#allocation2 + $0x18] sm:$0xff] %vm343_vm0, %v330_v17  ;;  %v1451_v15 = vld [vmem:[#allocation2 + $0x150] sm:$0xff] }
 0x1d0   : > { %1212 = vmatpush.msrb.mxu0 %v1209_v18 }
 0x1d2   : > { %1213 = vmatpush.msrb.mxu0 %v1208_v20 }
 0x1d4   : > { %1214 = vmatpush.msrb.mxu0 %v1207_v22 }
 0x1d5   : > { %v382_v25 = vpop.trf.xlu0  ;;  %v946_v26 = vld [vmem:[#allocation2 + $0x98] sm:$0xff]  ;;  %v331_v28 = vpop.trf.xlu1  ;;  %780 = vmatmul.f32.gmra.mxu0 %v2315_v23 }
 0x1d6   : > { %1215 = vmatpush.msrb.mxu0 %v1206_v24  ;;  %399 = vst.msk [vmem:[#allocation2 + $0xa0] sm:$0xff] %vm343_vm0, %v382_v25  ;;  %971 = vmatpush.msra.mxu2 %v946_v26  ;;  %v944_v31 = vld [vmem:[#allocation2 + $0x18] sm:$0xff]  ;;  %v2377_v26 = vld [vmem:[#allocation2 + $0x3f0] sm:$0xff] }
 0x1d7   : > { %348 = vst.msk [vmem:[#allocation2 + $0x20] sm:$0xff] %vm343_vm0, %v331_v28  ;;  %v2373_v24 = vld [vmem:[#allocation2 + $0x3f8] sm:$0xff]  ;;  %v2384_v28 = vld [vmem:[#allocation2 + $0x370] sm:$0xff] }
 0x1d8   : > { %1216 = vmatpush.msrb.mxu0 %v1205_v29  ;;  %972 = vmatpush.msra.mxu2 %v945_v27  ;;  %v2381_v27 = vld [vmem:[#allocation2 + $0x378] sm:$0xff] }
 0x1da   : > { %1217 = vmatpush.msrb.mxu0 %v1204_v32  ;;  %973 = vmatpush.msra.mxu2 %v944_v31  ;;  %v2392_v32 = vld [vmem:[#allocation2 + $0x2f0] sm:$0xff] }
 0x1dc   : > { %1218 = vmatpush.msrb.mxu0 %v1203_v34  ;;  %974 = vmatpush.msra.mxu2 %v943_v33  ;;  %v2396_v33 = vld [vmem:[#allocation2 + $0x278] sm:$0xff]  ;;  %v2399_v34 = vld [vmem:[#allocation2 + $0x270] sm:$0xff] }
 0x1dd   : > { %v383_v38 = vpop.trf.xlu0  ;;  %975 = vmatmul.f32.vlgmr.msra.gmra.mxu2 %v2303_v14  ;;  %v332_v39 = vpop.trf.xlu1  ;;  %783 = vmatmul.f32.gmra.mxu0 %v2327_v36 }
 0x1de   : > { %1219 = vmatpush.msrb.mxu0 %v1202_v37  ;;  %400 = vst.msk [vmem:[#allocation2 + $0xa8] sm:$0xff] %vm343_vm0, %v383_v38  ;;  %v2403_v37 = vld [vmem:[#allocation2 + $0x1f8] sm:$0xff] }
 0x1df   : > { %349 = vst.msk [vmem:[#allocation2 + $0x28] sm:$0xff] %vm343_vm0, %v332_v39  ;;  %v2407_v39 = vld [vmem:[#allocation2 + $0x1f0] sm:$0xff] }
 0x1e0   : > { %1220 = vmatpush.msrb.mxu0 %v1201_v40  ;;  %v2410_v40 = vld [vmem:[#allocation2 + $0x178] sm:$0xff] }
 0x1e2   : > { %1221 = vmatpush.msrb.mxu0 %v1200_v41  ;;  %v2413_v41 = vld [vmem:[#allocation2 + $0x170] sm:$0xff] }
 0x1e3   : > { %748 = vperm.xlu1 %2047, %v722_v43  }
 0x1e4   : > { %1222 = vmatpush.msrb.mxu0 %v1199_v44 }
 0x1e5   : > { %v384_v47 = vpop.trf.xlu0  ;;  %978 = vmatmul.f32.gmra.mxu2 %v2315_v23  ;;  %v333_v48 = vpop.trf.xlu1  ;;  %786 = vmatmul.f32.gmra.mxu0 %v2343_v46 }
 0x1e6   : > { %401 = vst.msk [vmem:[#allocation2 + $0xb0] sm:$0xff] %vm343_vm0, %v384_v47 }
 0x1e7   : > { %350 = vst.msk [vmem:[#allocation2 + $0x30] sm:$0xff] %vm343_vm0, %v333_v48 }
 0x1ed   : > { %v385_v51 = vpop.trf.xlu0  ;;  %981 = vmatmul.f32.gmra.mxu2 %v2327_v36  ;;  %v334_v52 = vpop.trf.xlu1  ;;  %v1197_v57 = vld [vmem:[#allocation2 + $0xb0] sm:$0xff] }
 0x1ee   : > { %402 = vst.msk [vmem:[#allocation2 + $0xb8] sm:$0xff] %vm343_vm0, %v385_v51  ;;  %v1195_v60 = vld [vmem:[#allocation2 + $0x30] sm:$0xff] }
 0x1ef   : > { %351 = vst.msk [vmem:[#allocation2 + $0x38] sm:$0xff] %vm343_vm0, %v334_v52 }
 0x1f5   : > { %v386_v55 = vpop.trf.xlu0  ;;  %984 = vmatmul.f32.gmra.mxu2 %v2343_v46  ;;  %v1198_v56 = vld [vmem:[#allocation2 + $0xb8] sm:$0xff]  ;;  %v335_v58 = vpop.trf.xlu1 }
 0x1f6   : > { %403 = vst.msk [vmem:[#allocation2 + $0xc0] sm:$0xff] %vm343_vm0, %v386_v55  ;;  %1223 = vmatpush.msrb.mxu0 %v1198_v56  ;;  %v1196_v59 = vld [vmem:[#allocation2 + $0x38] sm:$0xff] }
 0x1f7   : > { %753 = vperm.xlu0 %2046, %v723_v54   ;;  %352 = vst.msk [vmem:[#allocation2 + $0x40] sm:$0xff] %vm343_vm0, %v335_v58 }
 0x1f8   : > { %1224 = vmatpush.msrb.mxu0 %v1197_v57 }
 0x1fa   : > { %1225 = vmatpush.msrb.mxu0 %v1196_v59  ;;  %v2439_v59 = vpop.permute.xlu2 %743 }
 0x1fc   : > { %1226 = vmatpush.msrb.mxu0 %v1195_v60 }
 0x1fd   : > { %v387_v61 = vpop.trf.xlu0  ;;  %1227 = vmatmul.f32.vlgmr.msrb.gmra.mxu0 %v2303_v14  ;;  %v336_v63 = vpop.trf.xlu1 }
 0x1fe   : > { %404 = vst.msk [vmem:[#allocation2 + $0xc8] sm:$0xff] %vm343_vm0, %v387_v61  ;;  %1463 = vmatpush.msra.mxu0 %v1462_v62 }
 0x1ff   : > { %353 = vst.msk [vmem:[#allocation2 + $0x48] sm:$0xff] %vm343_vm0, %v336_v63 }
 0x200   : > { %1464 = vmatpush.msra.mxu0 %v1461_v0 }
 0x202   : > { %1465 = vmatpush.msra.mxu0 %v1460_v1 }
 0x204   : > { %1466 = vmatpush.msra.mxu0 %v1459_v2 }
 0x205   : > { %v388_v3 = vpop.trf.xlu0  ;;  %1230 = vmatmul.f32.gmra.mxu0 %v2315_v23  ;;  %v337_v5 = vpop.trf.xlu1 }
 0x206   : > { %405 = vst.msk [vmem:[#allocation2 + $0xd0] sm:$0xff] %vm343_vm0, %v388_v3  ;;  %1467 = vmatpush.msra.mxu0 %v1458_v4 }
 0x207   : > { %354 = vst.msk [vmem:[#allocation2 + $0x50] sm:$0xff] %vm343_vm0, %v337_v5 }
 0x208   : > { %1468 = vmatpush.msra.mxu0 %v1457_v6  ;;  %v2448_v6 = vld [vmem:[%s2757_s3] sm:$0xff] }
 0x20a   : > { %1469 = vmatpush.msra.mxu0 %v1456_v7  ;;  %v1084_v7 = vld [vmem:[#allocation2 + $0x3a8] sm:$0xff] }
 0x20c   : > { %1470 = vmatpush.msra.mxu0 %v1455_v8 }
 0x20d   : > { %v389_v9 = vpop.trf.xlu0  ;;  %1233 = vmatmul.f32.gmra.mxu0 %v2327_v36  ;;  %v338_v11 = vpop.trf.xlu1  ;;  %v1449_v18 = vld [vmem:[#allocation2 + $0xd0] sm:$0xff] }
 0x20e   : > { %406 = vst.msk [vmem:[#allocation2 + $0xd8] sm:$0xff] %vm343_vm0, %v389_v9  ;;  %1471 = vmatpush.msra.mxu0 %v1454_v10  ;;  %v1447_v21 = vld [vmem:[#allocation2 + $0x50] sm:$0xff]  ;;  %v1083_v9 = vld [vmem:[#allocation2 + $0x3a0] sm:$0xff] }
 0x20f   : > { %355 = vst.msk [vmem:[#allocation2 + $0x58] sm:$0xff] %vm343_vm0, %v338_v11 }
 0x210   : > { %1472 = vmatpush.msra.mxu0 %v1453_v12 }
 0x212   : > { %1473 = vmatpush.msra.mxu0 %v1452_v13  ;;  %v1082_v13 = vld [vmem:[#allocation2 + $0x328] sm:$0xff] }
 0x214   : > { %1474 = vmatpush.msra.mxu0 %v1451_v15 }
 0x215   : > { %v390_v16 = vpop.trf.xlu0  ;;  %1236 = vmatmul.f32.gmra.mxu0 %v2343_v46  ;;  %v1450_v17 = vld [vmem:[#allocation2 + $0xd8] sm:$0xff]  ;;  %v339_v19 = vpop.trf.xlu1 }
 0x216   : > { %407 = vst.msk [vmem:[#allocation2 + $0xe0] sm:$0xff] %vm343_vm0, %v390_v16  ;;  %1475 = vmatpush.msra.mxu0 %v1450_v17  ;;  %v1448_v20 = vld [vmem:[#allocation2 + $0x58] sm:$0xff]  ;;  %v2458_v16 = vld [vmem:[%s2757_s3 + $0x8] sm:$0xff] }
 0x217   : > { %356 = vst.msk [vmem:[#allocation2 + $0x60] sm:$0xff] %vm343_vm0, %v339_v19  ;;  %v1081_v19 = vld [vmem:[#allocation2 + $0x320] sm:$0xff] }
 0x218   : > { %1476 = vmatpush.msra.mxu0 %v1449_v18 }
 0x21a   : > { %1477 = vmatpush.msra.mxu0 %v1448_v20 }
 0x21c   : > { %1478 = vmatpush.msra.mxu0 %v1447_v21 }
 0x21d   : > { %v391_v22 = vpop.trf.xlu0  ;;  %1479 = vmatmul.f32.vlgmr.msra.gmra.mxu0 %v2303_v14  ;;  %v340_v25 = vpop.trf.xlu1 }
 0x21e   : > { %408 = vst.msk [vmem:[#allocation2 + $0xe8] sm:$0xff] %vm343_vm0, %v391_v22  ;;  %1715 = vmatpush.msrb.mxu0 %v2373_v24  ;;  %v1080_v22 = vld [vmem:[#allocation2 + $0x2a8] sm:$0xff] }
 0x21f   : > { %357 = vst.msk [vmem:[#allocation2 + $0x68] sm:$0xff] %vm343_vm0, %v340_v25 }
 0x220   : > { %1716 = vmatpush.msrb.mxu0 %v2377_v26 }
 0x222   : > { %1717 = vmatpush.msrb.mxu0 %v2381_v27 }
 0x224   : > { %1718 = vmatpush.msrb.mxu0 %v2384_v28 }
 0x225   : > { %v392_v29 = vpop.trf.xlu0  ;;  %1482 = vmatmul.f32.gmra.mxu0 %v2315_v23  ;;  %v341_v31 = vpop.trf.xlu1 }
 0x226   : > { %409 = vst.msk [vmem:[#allocation2 + $0xf0] sm:$0xff] %vm343_vm0, %v392_v29  ;;  %1719 = vmatpush.msrb.mxu0 %v2388_v30 }
 0x227   : > { %358 = vst.msk [vmem:[#allocation2 + $0x70] sm:$0xff] %vm343_vm0, %v341_v31  ;;  %v1079_v31 = vld [vmem:[#allocation2 + $0x2a0] sm:$0xff] }
 0x228   : > { %1720 = vmatpush.msrb.mxu0 %v2392_v32 }
 0x22a   : > { %1721 = vmatpush.msrb.mxu0 %v2396_v33 }
 0x22c   : > { %1722 = vmatpush.msrb.mxu0 %v2399_v34 }
 0x22d   : > { %v393_v35 = vpop.trf.xlu0  ;;  %1485 = vmatmul.f32.gmra.mxu0 %v2327_v36  ;;  %v342_v38 = vpop.trf.xlu1  ;;  %v2420_v43 = vld [vmem:[#allocation2 + $0xf0] sm:$0xff] }
 0x22e   : > { %410 = vst.msk [vmem:[#allocation2 + $0xf8] sm:$0xff] %vm343_vm0, %v393_v35  ;;  %1723 = vmatpush.msrb.mxu0 %v2403_v37  ;;  %v2426_v45 = vld [vmem:[#allocation2 + $0x70] sm:$0xff] }
 0x22f   : > { %359 = vst.msk [vmem:[#allocation2 + $0x78] sm:$0xff] %vm343_vm0, %v342_v38  ;;  %v1078_v38 = vld [vmem:[#allocation2 + $0x228] sm:$0xff] }
 0x230   : > { %1724 = vmatpush.msrb.mxu0 %v2407_v39 }
 0x232   : > { %1725 = vmatpush.msrb.mxu0 %v2410_v40 }
 0x234   : > { %1726 = vmatpush.msrb.mxu0 %v2413_v41 }
 0x235   : > { %1488 = vmatmul.f32.gmra.mxu0 %v2343_v46  ;;  %v2418_v42 = vld [vmem:[#allocation2 + $0xf8] sm:$0xff] }
 0x236   : > { %1727 = vmatpush.msrb.mxu0 %v2418_v42  ;;  %v2423_v44 = vld [vmem:[#allocation2 + $0x78] sm:$0xff] }
 0x238   : > { %1728 = vmatpush.msrb.mxu0 %v2420_v43 }
 0x23a   : > { %1729 = vmatpush.msrb.mxu0 %v2423_v44 }
 0x23c   : > { %1730 = vmatpush.msrb.mxu0 %v2426_v45 }
 0x23d   : > { %1731 = vmatmul.f32.vlgmr.msrb.gmra.mxu0 %v2303_v14 }
 0x245   : > { %1734 = vmatmul.f32.gmra.mxu0 %v2315_v23 }
 0x24a   : > { %v778_v47 = vpop.f32.mrf.mxu0 }
 0x24b   : > { %v779_v61 = vadd.f32 %v778_v47, %v2439_v59 }
 0x24d   : > { %1737 = vmatmul.f32.gmra.mxu0 %v2327_v36  ;;  %v790_v1 = vmul.f32 0.01, %v779_v61 }
 0x24f   : > { %v794_v5 = vmax.f32 %v779_v61, %v790_v1  ;;  %v1073_v61 = vld [vmem:[#allocation2 + $0x120] sm:$0xff]  ;;  %v1070_v1 = vld [vmem:[#allocation2 + $0x28] sm:$0xff] }
 0x252   : > { %v781_v48 = vpop.f32.mrf.mxu0 }
 0x255   : > { %v2436_v54 = vpop.permute.xlu1 %748 }
 0x256   : > { %v782_v58 = vadd.f32 %v781_v48, %v2436_v54 }
 0x258   : > { %v791_v0 = vmul.f32 0.01, %v782_v58 }
 0x25a   : > { %v784_v49 = vpop.f32.mrf.mxu0  ;;  %v795_v4 = vmax.f32 %v782_v58, %v791_v0  ;;  %v2475_v58 = vld [vmem:[%s2757_s3 + $0x18] sm:$0xff] }
 0x260   : > { %v976_v51 = vpop.f32.mrf.mxu2 }
 0x261   : > { %v977_v17 = vadd.f32 %v976_v51, %v2439_v59  ;;  %v1077_v51 = vld [vmem:[#allocation2 + $0x220] sm:$0xff] }
 0x262   : > { %v787_v52 = vpop.f32.mrf.mxu0 }
 0x263   : > { %v788_v53 = vadd.f32 %v787_v52, %v2433_v50  ;;  %v988_v29 = vmul.f32 0.01, %v977_v17 }
 0x265   : > { %v793_v55 = vmul.f32 0.01, %v788_v53  ;;  %v992_v52 = vmax.f32 %v977_v17, %v988_v29  ;;  %v1334_v17 = vld [vmem:[#allocation2 + $0x348] sm:$0xff]  ;;  %v1331_v29 = vld [vmem:[#allocation2 + $0x2c0] sm:$0xff] }
 0x267   : > { %v797_v57 = vmax.f32 %v788_v53, %v793_v55  ;;  %v1076_v53 = vld [vmem:[#allocation2 + $0x1a8] sm:$0xff]  ;;  %v1075_v55 = vld [vmem:[#allocation2 + $0x1a0] sm:$0xff] }
 0x268   : > { %v979_v56 = vpop.f32.mrf.mxu2 }
 0x269   : > { %v2441_v60 = vpop.permute.xlu0 %753  ;;  %851 = vmatpush.msra.mxu1 %v797_v57  ;;  %v980_v11 = vadd.f32 %v979_v56, %v2436_v54  ;;  %v1074_v56 = vld [vmem:[#allocation2 + $0x128] sm:$0xff] }
 0x26a   : > { %v785_v62 = vadd.f32 %v784_v49, %v2441_v60  ;;  %v2466_v49 = vld [vmem:[%s2757_s3 + $0x10] sm:$0xff] }
 0x26b   : > { %v989_v21 = vmul.f32 0.01, %v980_v11 }
 0x26c   : > { %v792_v63 = vmul.f32 0.01, %v785_v62 }
 0x26d   : > { %v993_v47 = vmax.f32 %v980_v11, %v989_v21  ;;  %v1335_v11 = vld [vmem:[#allocation2 + $0x3c0] sm:$0xff] }
 0x26e   : > { %v796_v2 = vmax.f32 %v785_v62, %v792_v63  ;;  %v1072_v62 = vld [vmem:[#allocation2 + $0xa8] sm:$0xff]  ;;  %v1071_v63 = vld [vmem:[#allocation2 + $0xa0] sm:$0xff] }
 0x270   : > { %852 = vmatpush.msra.mxu1 %v796_v2  ;;  %v982_v3 = vpop.f32.mrf.mxu2 }
 0x271   : > { %v983_v8 = vadd.f32 %v982_v3, %v2441_v60 }
 0x272   : > { %853 = vmatpush.msra.mxu1 %v795_v4 }
 0x273   : > { %v990_v18 = vmul.f32 0.01, %v983_v8 }
 0x274   : > { %854 = vmatpush.msra.mxu1 %v794_v5  ;;  %v1069_v5 = vld [vmem:[#allocation2 + $0x20] sm:$0xff] }
 0x275   : > { %1964 = vmatmul.msk.f32.vlgmr.msra.gmra.mxu1 %vm826_vm1, %v2448_v6  ;;  %v994_v35 = vmax.f32 %v983_v8, %v990_v18 }
 0x276   : > { %1085 = vmatpush.msrb.mxu1 %v1084_v7  ;;  %v1336_v7 = vld [vmem:[#allocation2 + $0x3c8] sm:$0xff] }
 0x278   : > { %1086 = vmatpush.msrb.mxu1 %v1083_v9  ;;  %v985_v10 = vpop.f32.mrf.mxu2 }
 0x279   : > { %v986_v12 = vadd.f32 %v985_v10, %v2433_v50 }
 0x27a   : > { %1087 = vmatpush.msrb.mxu1 %v1082_v13  ;;  %v1228_v15 = vpop.f32.mrf.mxu0 }
 0x27b   : > { %v991_v20 = vmul.f32 0.01, %v986_v12  ;;  %v1229_v8 = vadd.f32 %v1228_v15, %v2439_v59  ;;  %v1333_v15 = vld [vmem:[#allocation2 + $0x340] sm:$0xff] }
 0x27c   : > { %1088 = vmatpush.msrb.mxu1 %v1081_v19 }
 0x27d   : > { %1965 = vmatmul.msk.f32.gmra.mxu1 %vm826_vm1, %v2458_v16  ;;  %v995_v25 = vmax.f32 %v986_v12, %v991_v20  ;;  %v1240_v18 = vmul.f32 0.01, %v1229_v8 }
 0x27e   : > { %1089 = vmatpush.msrb.mxu1 %v1080_v22  ;;  %v1332_v22 = vld [vmem:[#allocation2 + $0x2c8] sm:$0xff] }
 0x27f   : > { %1008 = vmatpush.msra.mxu3 %v995_v25  ;;  %v2497_v25 = vmax.f32 %v1229_v8, %v1240_v18 }
 0x280   : > { %1090 = vmatpush.msrb.mxu1 %v1079_v31  ;;  %v1330_v31 = vld [vmem:[#allocation2 + $0x248] sm:$0xff] }
 0x281   : > { %1009 = vmatpush.msra.mxu3 %v994_v35  ;;  %v1329_v35 = vld [vmem:[#allocation2 + $0x240] sm:$0xff] }
 0x282   : > { %1091 = vmatpush.msrb.mxu1 %v1078_v38  ;;  %v1231_v48 = vpop.f32.mrf.mxu0 }
 0x283   : > { %1010 = vmatpush.msra.mxu3 %v993_v47  ;;  %v1232_v3 = vadd.f32 %v1231_v48, %v2436_v54  ;;  %v1328_v47 = vld [vmem:[#allocation2 + $0x1c8] sm:$0xff]  ;;  %v1327_v48 = vld [vmem:[#allocation2 + $0x1c0] sm:$0xff] }
 0x284   : > { %1092 = vmatpush.msrb.mxu1 %v1077_v51  ;;  %v1326_v51 = vld [vmem:[#allocation2 + $0x148] sm:$0xff] }
 0x285   : > { %1966 = vmatmul.msk.f32.gmra.mxu1 %vm826_vm1, %v2466_v49  ;;  %1011 = vmatpush.msra.mxu3 %v992_v52  ;;  %v1241_v12 = vmul.f32 0.01, %v1232_v3  ;;  %v1325_v52 = vld [vmem:[#allocation2 + $0x140] sm:$0xff] }
 0x286   : > { %1093 = vmatpush.msrb.mxu1 %v1076_v53  ;;  %1968 = vmatmul.msk.f32.vlgmr.msra.gmra.mxu3 %vm826_vm1, %v2448_v6 }
 0x287   : > { %v2494_v21 = vmax.f32 %v1232_v3, %v1241_v12 }
 0x288   : > { %1094 = vmatpush.msrb.mxu1 %v1075_v55  ;;  %v1324_v55 = vld [vmem:[#allocation2 + $0xc8] sm:$0xff] }
 0x28a   : > { %1095 = vmatpush.msrb.mxu1 %v1074_v56  ;;  %v1234_v57 = vpop.f32.mrf.mxu0  ;;  %v1323_v56 = vld [vmem:[#allocation2 + $0xc0] sm:$0xff] }
 0x28b   : > { %v1235_v0 = vadd.f32 %v1234_v57, %v2441_v60  ;;  %v1322_v57 = vld [vmem:[#allocation2 + $0x48] sm:$0xff] }
 0x28c   : > { %1096 = vmatpush.msrb.mxu1 %v1073_v61 }
 0x28d   : > { %1967 = vmatmul.msk.f32.gmra.mxu1 %vm826_vm1, %v2475_v58  ;;  %v1242_v9 = vmul.f32 0.01, %v1235_v0 }
 0x28e   : > { %1097 = vmatpush.msrb.mxu1 %v1072_v62  ;;  %1969 = vmatmul.msk.f32.gmra.mxu3 %vm826_vm1, %v2458_v16  ;;  %v1321_v62 = vld [vmem:[#allocation2 + $0x40] sm:$0xff] }
 0x28f   : > { %v2491_v19 = vmax.f32 %v1235_v0, %v1242_v9 }
 0x290   : > { %1098 = vmatpush.msrb.mxu1 %v1071_v63 }
 0x292   : > { %1099 = vmatpush.msrb.mxu1 %v1070_v1  ;;  %v1237_v2 = vpop.f32.mrf.mxu0 }
 0x293   : > { %v1238_v4 = vadd.f32 %v1237_v2, %v2433_v50  ;;  %v1588_v2 = vld [vmem:[#allocation2 + $0x3e8] sm:$0xff] }
 0x294   : > { %1100 = vmatpush.msrb.mxu1 %v1069_v5 }
 0x295   : > { %v1243_v10 = vmul.f32 0.01, %v1238_v4  ;;  %1101 = vmatmul.f32.vlgmr.msrb.gmra.mxu1 %v2303_v14 }
 0x296   : > { %1337 = vmatpush.msra.mxu1 %v1336_v7  ;;  %1970 = vmatmul.msk.f32.gmra.mxu3 %vm826_vm1, %v2466_v49  ;;  %v1587_v7 = vld [vmem:[#allocation2 + $0x3e0] sm:$0xff] }
 0x297   : > { %v2488_v13 = vmax.f32 %v1238_v4, %v1243_v10  ;;  %v1586_v10 = vld [vmem:[#allocation2 + $0x368] sm:$0xff] }
 0x298   : > { %1338 = vmatpush.msra.mxu1 %v1335_v11 }
 0x299   : > { %1260 = vmatpush.msrb.mxu2 %v2488_v13 }
 0x29a   : > { %1339 = vmatpush.msra.mxu1 %v1334_v17  ;;  %v1480_v20 = vpop.f32.mrf.mxu0  ;;  %v1585_v17 = vld [vmem:[#allocation2 + $0x360] sm:$0xff] }
 0x29b   : > { %1261 = vmatpush.msrb.mxu2 %v2491_v19  ;;  %v1481_v3 = vadd.f32 %v1480_v20, %v2439_v59  ;;  %v1583_v20 = vld [vmem:[#allocation2 + $0x2e0] sm:$0xff] }
 0x29c   : > { %1340 = vmatpush.msra.mxu1 %v1333_v15  ;;  %v1584_v15 = vld [vmem:[#allocation2 + $0x2e8] sm:$0xff] }
 0x29d   : > { %1262 = vmatpush.msrb.mxu2 %v2494_v21  ;;  %1104 = vmatmul.f32.gmra.mxu1 %v2315_v23  ;;  %v1492_v11 = vmul.f32 0.01, %v1481_v3 }
 0x29e   : > { %1341 = vmatpush.msra.mxu1 %v1332_v22  ;;  %1971 = vmatmul.msk.f32.gmra.mxu3 %vm826_vm1, %v2475_v58 }
 0x29f   : > { %1263 = vmatpush.msrb.mxu2 %v2497_v25  ;;  %v1496_v22 = vmax.f32 %v1481_v3, %v1492_v11 }
 0x2a0   : > { %1342 = vmatpush.msra.mxu1 %v1331_v29  ;;  %1976 = vmatmul.msk.f32.vlgmr.msrb.gmra.mxu2 %vm826_vm1, %v2448_v6  ;;  %v1582_v29 = vld [vmem:[#allocation2 + $0x268] sm:$0xff] }
 0x2a2   : > { %1343 = vmatpush.msra.mxu1 %v1330_v31  ;;  %v1483_v38 = vpop.f32.mrf.mxu0  ;;  %v1581_v31 = vld [vmem:[#allocation2 + $0x260] sm:$0xff] }
 0x2a3   : > { %v1484_v0 = vadd.f32 %v1483_v38, %v2436_v54  ;;  %v1579_v38 = vld [vmem:[#allocation2 + $0x1e0] sm:$0xff] }
 0x2a4   : > { %1344 = vmatpush.msra.mxu1 %v1329_v35  ;;  %v1580_v35 = vld [vmem:[#allocation2 + $0x1e8] sm:$0xff] }
 0x2a5   : > { %1107 = vmatmul.f32.gmra.mxu1 %v2327_v36  ;;  %v1493_v8 = vmul.f32 0.01, %v1484_v0 }
 0x2a6   : > { %1345 = vmatpush.msra.mxu1 %v1328_v47  ;;  %v1578_v47 = vld [vmem:[#allocation2 + $0x168] sm:$0xff] }
 0x2a7   : > { %v1497_v18 = vmax.f32 %v1484_v0, %v1493_v8 }
 0x2a8   : > { %1346 = vmatpush.msra.mxu1 %v1327_v48  ;;  %1977 = vmatmul.msk.f32.gmra.mxu2 %vm826_vm1, %v2458_v16  ;;  %v2522_v48 = vpop.permute.xlu2 %808 }
 0x2aa   : > { %1347 = vmatpush.msra.mxu1 %v1326_v51  ;;  %v1486_v53 = vpop.f32.mrf.mxu0  ;;  %v1577_v51 = vld [vmem:[#allocation2 + $0x160] sm:$0xff] }
 0x2ab   : > { %v1487_v61 = vadd.f32 %v1486_v53, %v2441_v60  ;;  %v1575_v53 = vld [vmem:[#allocation2 + $0xe0] sm:$0xff] }
 0x2ac   : > { %1348 = vmatpush.msra.mxu1 %v1325_v52  ;;  %v1576_v52 = vld [vmem:[#allocation2 + $0xe8] sm:$0xff] }
 0x2ad   : > { %1110 = vmatmul.f32.gmra.mxu1 %v2343_v46  ;;  %v1494_v4 = vmul.f32 0.01, %v1487_v61 }
 0x2ae   : > { %1349 = vmatpush.msra.mxu1 %v1324_v55  ;;  %v1574_v55 = vld [vmem:[#allocation2 + $0x68] sm:$0xff] }
 0x2af   : > { %v1498_v12 = vmax.f32 %v1487_v61, %v1494_v4 }
 0x2b0   : > { %1350 = vmatpush.msra.mxu1 %v1323_v56  ;;  %1978 = vmatmul.msk.f32.gmra.mxu2 %vm826_vm1, %v2466_v49  ;;  %v1573_v56 = vld [vmem:[#allocation2 + $0x60] sm:$0xff] }
 0x2b2   : > { %1351 = vmatpush.msra.mxu1 %v1322_v57  ;;  %v1489_v63 = vpop.f32.mrf.mxu0  ;;  %v2527_v57 = vpop.permute.xlu2 %813 }
 0x2b3   : > { %v1490_v1 = vadd.f32 %v1489_v63, %v2433_v50 }
 0x2b4   : > { %1352 = vmatpush.msra.mxu1 %v1321_v62 }
 0x2b5   : > { %v1495_v5 = vmul.f32 0.01, %v1490_v1  ;;  %1353 = vmatmul.f32.vlgmr.msra.gmra.mxu1 %v2303_v14 }
 0x2b6   : > { %1589 = vmatpush.msrb.mxu1 %v1588_v2 }
 0x2b7   : > { %v1499_v9 = vmax.f32 %v1490_v1, %v1495_v5 }
 0x2b8   : > { %1590 = vmatpush.msrb.mxu1 %v1587_v7 }
 0x2b9   : > { %1512 = vmatpush.msra.mxu2 %v1499_v9 }
 0x2ba   : > { %1591 = vmatpush.msrb.mxu1 %v1586_v10  ;;  %v2537_v61 = vpop.permute.xlu2 %818 }
 0x2bb   : > { %1513 = vmatpush.msra.mxu2 %v1498_v12 }
 0x2bc   : > { %1592 = vmatpush.msrb.mxu1 %v1585_v17 }
 0x2bd   : > { %1514 = vmatpush.msra.mxu2 %v1497_v18  ;;  %1356 = vmatmul.f32.gmra.mxu1 %v2315_v23 }
 0x2be   : > { %1593 = vmatpush.msrb.mxu1 %v1584_v15 }
 0x2bf   : > { %1515 = vmatpush.msra.mxu2 %v1496_v22 }
 0x2c0   : > { %1594 = vmatpush.msrb.mxu1 %v1583_v20  ;;  %1984 = vmatmul.msk.f32.vlgmr.msra.gmra.mxu2 %vm826_vm1, %v2448_v6 }
 0x2c2   : > { %1595 = vmatpush.msrb.mxu1 %v1582_v29 }
 0x2c4   : > { %1596 = vmatpush.msrb.mxu1 %v1581_v31 }
 0x2c5   : > { %1359 = vmatmul.f32.gmra.mxu1 %v2327_v36 }
 0x2c6   : > { %1597 = vmatpush.msrb.mxu1 %v1580_v35 }
 0x2c8   : > { %1598 = vmatpush.msrb.mxu1 %v1579_v38  ;;  %1985 = vmatmul.msk.f32.gmra.mxu2 %vm826_vm1, %v2458_v16 }
 0x2ca   : > { %1599 = vmatpush.msrb.mxu1 %v1578_v47 }
 0x2cc   : > { %1600 = vmatpush.msrb.mxu1 %v1577_v51 }
 0x2cd   : > { %1362 = vmatmul.f32.gmra.mxu1 %v2343_v46 }
 0x2ce   : > { %1601 = vmatpush.msrb.mxu1 %v1576_v52 }
 0x2d0   : > { %1602 = vmatpush.msrb.mxu1 %v1575_v53  ;;  %1986 = vmatmul.msk.f32.gmra.mxu2 %vm826_vm1, %v2466_v49 }
 0x2d2   : > { %1603 = vmatpush.msrb.mxu1 %v1574_v55 }
 0x2d4   : > { %1604 = vmatpush.msrb.mxu1 %v1573_v56 }
 0x2d5   : > { %1605 = vmatmul.f32.vlgmr.msrb.gmra.mxu1 %v2303_v14  ;;  %v2546_v14 = vpop.permute.xlu2 %823 }
 0x2d6   : > { %2003 = vmatpush.msra.mxu1 %v2373_v24 }
 0x2d8   : > { %2004 = vmatpush.msra.mxu1 %v2377_v26  ;;  %1987 = vmatmul.msk.f32.gmra.mxu2 %vm826_vm1, %v2475_v58 }
 0x2da   : > { %2005 = vmatpush.msra.mxu1 %v2381_v27 }
 0x2dc   : > { %2006 = vmatpush.msra.mxu1 %v2384_v28 }
 0x2dd   : > { %1608 = vmatmul.f32.gmra.mxu1 %v2315_v23  ;;  %v2554_v23 = vpop.permute.xlu2 %883 }
 0x2de   : > { %2007 = vmatpush.msra.mxu1 %v2388_v30 }
 0x2e0   : > { %2008 = vmatpush.msra.mxu1 %v2392_v32 }
 0x2e2   : > { %2009 = vmatpush.msra.mxu1 %v2396_v33 }
 0x2e4   : > { %2010 = vmatpush.msra.mxu1 %v2399_v34 }
 0x2e5   : > { %1611 = vmatmul.f32.gmra.mxu1 %v2327_v36  ;;  %v2560_v32 = vpop.permute.xlu2 %888 }
 0x2e6   : > { %2011 = vmatpush.msra.mxu1 %v2403_v37 }
 0x2e8   : > { %2012 = vmatpush.msra.mxu1 %v2407_v39 }
 0x2ea   : > { %2013 = vmatpush.msra.mxu1 %v2410_v40 }
 0x2ec   : > { %2014 = vmatpush.msra.mxu1 %v2413_v41 }
 0x2ed   : > { %1614 = vmatmul.f32.gmra.mxu1 %v2343_v46 }
 0x2ee   : > { %2015 = vmatpush.msra.mxu1 %v2418_v42 }
 0x2f0   : > { %2016 = vmatpush.msra.mxu1 %v2420_v43 }
 0x2f2   : > { %2017 = vmatpush.msra.mxu1 %v2423_v44  ;;  %v856_v24 = vpop.f32.mrf.mxu1 }
 0x2f3   : > { %v857_v36 = vadd.f32 %v856_v24, %v2522_v48 }
 0x2f4   : > { %2018 = vmatpush.msra.mxu1 %v2426_v45  ;;  %v2567_v45 = vpop.permute.xlu2 %893 }
 0x2f5   : > { %v868_v26 = vmul.f32 0.01, %v857_v36  ;;  %1740 = vmatmul.f32.vlgmr.msra.gmra.mxu1 %v2343_v46 }
 0x2f7   : > { %v872_v28 = vmax.f32 %v857_v36, %v868_v26 }
 0x2f9   : > { %v901_v34 = vmul.f32 %v2554_v23, %v872_v28 }
 0x2fa   : > { %v859_v27 = vpop.f32.mrf.mxu1 }
 0x2fb   : > { %v860_v30 = vadd.f32 %v859_v27, %v2527_v57  ;;  %v905_v41 = vsel %vm343_vm0, %v901_v34, 0.0 }
 0x2fc   : > { %v2573_v10 = vpop.permute.xlu2 %898 }
 0x2fd   : > { %v869_v33 = vmul.f32 0.01, %v860_v30 }
 0x2ff   : > { %v873_v37 = vmax.f32 %v860_v30, %v869_v33 }
 0x301   : > { %v902_v39 = vmul.f32 %v2560_v32, %v873_v37 }
 0x302   : > { %v862_v40 = vpop.f32.mrf.mxu1 }
 0x303   : > { %v906_v42 = vsel %vm343_vm0, %v902_v39, 0.0  ;;  %v863_v43 = vadd.f32 %v862_v40, %v2537_v61 }
 0x304   : > { %v907_v46 = vadd.f32 %v906_v42, %v905_v41  ;;  %v921_v30 = vpop.permute.xlu2 %920 }
 0x305   : > { %v870_v44 = vmul.f32 0.01, %v863_v43  ;;  %v2584_v40 = vperm.slane %v921_v30, 0 }
 0x307   : > { %v874_v62 = vmax.f32 %v863_v43, %v870_v44 }
 0x309   : > { %v903_v63 = vmul.f32 %v2567_v45, %v874_v62  ;;  %v1013_v0 = vpop.f32.mrf.mxu3 }
 0x30a   : > { %v1014_v1 = vadd.f32 %v1013_v0, %v2522_v48  ;;  %v865_v2 = vpop.f32.mrf.mxu1 }
 0x30b   : > { %v908_v3 = vsel %vm343_vm0, %v903_v63, 0.0  ;;  %v866_v4 = vadd.f32 %v865_v2, %v2546_v14 }
 0x30c   : > { %v909_v5 = vadd.f32 %v908_v3, %v907_v46  ;;  %v1025_v8 = vmul.f32 0.01, %v1014_v1 }
 0x30d   : > { %v871_v7 = vmul.f32 0.01, %v866_v4 }
 0x30e   : > { %v1029_v17 = vmax.f32 %v1014_v1, %v1025_v8 }
 0x30f   : > { %v875_v9 = vmax.f32 %v866_v4, %v871_v7 }
 0x310   : > { %v1033_v31 = vmul.f32 %v1029_v17, %v2554_v23 }
 0x311   : > { %v904_v11 = vmul.f32 %v2573_v10, %v875_v9  ;;  %v1016_v12 = vpop.f32.mrf.mxu3 }
 0x312   : > { %v1017_v18 = vadd.f32 %v1016_v12, %v2527_v57  ;;  %v1102_v22 = vpop.f32.mrf.mxu1  ;;  %v1037_v53 = vsel %vm343_vm0, %v1033_v31, 0.0 }
 0x313   : > { %v910_v15 = vsel %vm343_vm0, %v904_v11, 0.0 }
 0x314   : > { %v911_v20 = vadd.f32 %v910_v15, %v909_v5  ;;  %v1026_v29 = vmul.f32 0.01, %v1017_v18 }
 0x316   : > { %v912_v35 = vrot.slane %v911_v20, 4  ;;  %v1030_v38 = vmax.f32 %v1017_v18, %v1026_v29 }
 0x318   : > { %v913_v47 = vadd.f32 %v912_v35, %v911_v20  ;;  %v1034_v51 = vmul.f32 %v1030_v38, %v2560_v32  ;;  %v1103_v35 = vadd.f32 %v1102_v22, %v2439_v59 }
 0x319   : > { %v1019_v52 = vpop.f32.mrf.mxu3 }
 0x31a   : > { %v914_v55 = vrot.slane %v913_v47, 2  ;;  %v1038_v56 = vsel %vm343_vm0, %v1034_v51, 0.0  ;;  %v1020_v24 = vadd.f32 %v1019_v52, %v2537_v61  ;;  %v1105_v26 = vpop.f32.mrf.mxu1 }
 0x31b   : > { %v1039_v36 = vadd.f32 %v1038_v56, %v1037_v53  ;;  %v1106_v18 = vadd.f32 %v1105_v26, %v2436_v54  ;;  %v1114_v26 = vmul.f32 0.01, %v1103_v35 }
 0x31c   : > { %v915_v27 = vadd.f32 %v914_v55, %v913_v47  ;;  %v1027_v28 = vmul.f32 0.01, %v1020_v24 }
 0x31d   : > { %v1115_v53 = vmul.f32 0.01, %v1106_v18 }
 0x31e   : > { %v916_v33 = vrot.slane %v915_v27, 1  ;;  %v1031_v34 = vmax.f32 %v1020_v24, %v1027_v28 }
 0x320   : > { %v917_v37 = vadd.f32 %v916_v33, %v915_v27  ;;  %v1035_v39 = vmul.f32 %v1031_v34, %v2567_v45 }
 0x321   : > { %v1022_v41 = vpop.f32.mrf.mxu3 }
 0x322   : > { %v1040_v42 = vsel %vm343_vm0, %v1035_v39, 0.0  ;;  %v1023_v43 = vadd.f32 %v1022_v41, %v2546_v14  ;;  %v924_v46 = vadd.f32 %v2584_v40, %v917_v37  ;;  %v1108_v62 = vpop.f32.mrf.mxu1  ;;  %v1119_v37 = vmax.f32 %v1106_v18, %v1115_v53 }
 0x323   : > { %v1041_v44 = vadd.f32 %v1040_v42, %v1039_v36  ;;  %v1265_v63 = vpop.f32.mrf.mxu2  ;;  %v1109_v8 = vadd.f32 %v1108_v62, %v2441_v60 }
 0x324   : > { %v1028_v0 = vmul.f32 0.01, %v1023_v43  ;;  %v1266_v1 = vadd.f32 %v1265_v63, %v2522_v48  ;;  %v925_v3 = vsub.f32 0.0, %v924_v46 }
 0x325   : > { %v1116_v38 = vmul.f32 0.01, %v1109_v8 }
 0x326   : > { %v1032_v2 = vmax.f32 %v1023_v43, %v1028_v0  ;;  %v1277_v5 = vmul.f32 0.01, %v1266_v1  ;;  %v926_v9 = vmul.f32 1.442695, %v925_v3  ;;  %v1118_v43 = vmax.f32 %v1103_v35, %v1114_v26 }
 0x327   : > { %v1120_v28 = vmax.f32 %v1109_v8, %v1116_v38 }
 0x328   : > { %v1036_v4 = vmul.f32 %v1032_v2, %v2573_v10  ;;  %v1281_v15 = vmax.f32 %v1266_v1, %v1277_v5  ;;  %2048 = vpow2.f32 %v926_v9 }
 0x32a   : > { %v1042_v7 = vsel %vm343_vm0, %v1036_v4, 0.0  ;;  %v1111_v12 = vpop.f32.mrf.mxu1  ;;  %v1285_v55 = vmul.f32 %v1281_v15, %v2554_v23 }
 0x32b   : > { %v1043_v11 = vadd.f32 %v1042_v7, %v1041_v44  ;;  %v1268_v17 = vpop.f32.mrf.mxu2  ;;  %v1112_v20 = vadd.f32 %v1111_v12, %v2433_v50 }
 0x32c   : > { %v1269_v29 = vadd.f32 %v1268_v17, %v2527_v57  ;;  %v1289_v22 = vsel %vm343_vm0, %v1285_v55, 0.0 }
 0x32d   : > { %v1044_v31 = vrot.slane %v1043_v11, 4  ;;  %v1117_v47 = vmul.f32 0.01, %v1112_v20 }
 0x32e   : > { %v1278_v51 = vmul.f32 0.01, %v1269_v29  ;;  %v2049_v39 = vpop.eup %2048 }
 0x32f   : > { %v1045_v52 = vadd.f32 %v1044_v31, %v1043_v11  ;;  %v1121_v24 = vmax.f32 %v1112_v20, %v1117_v47  ;;  %v928_v44 = vadd.f32 1.0, %v2049_v39 }
 0x330   : > { %v1282_v56 = vmax.f32 %v1269_v29, %v1278_v51 }
 0x331   : > { %v1046_v36 = vrot.slane %v1045_v52, 2  ;;  %1134 = vmatpush.msrb.mxu3 %v1121_v24  ;;  %2050 = vrcp.f32 %v928_v44  ;;  %vm934_vm2 = vweird.f32 %v928_v44  ;;  %v940_v51 = vand.u32 2147483648, %v928_v44 }
 0x332   : > { %v1286_v27 = vmul.f32 %v1282_v56, %v2560_v32  ;;  %v1354_v33 = vpop.f32.mrf.mxu1  ;;  %v938_v53 = vand.u32 2147483647, %v928_v44 }
 0x333   : > { %v1047_v30 = vadd.f32 %v1046_v36, %v1045_v52  ;;  %1135 = vmatpush.msrb.mxu3 %v1120_v28  ;;  %v1355_v12 = vadd.f32 %v1354_v33, %v2439_v59 }
 0x334   : > { %v1290_v34 = vsel %vm343_vm0, %v1286_v27, 0.0  ;;  %vm939_vm9 = vcmp.eq.f32.partialorder %v938_v53, 8.507059e+37 }
 0x335   : > { %v1048_v41 = vrot.slane %v1047_v30, 1  ;;  %v2601_v42 = vadd.f32 %v1290_v34, %v1289_v22  ;;  %1136 = vmatpush.msrb.mxu3 %v1119_v37  ;;  %v1366_v38 = vmul.f32 0.01, %v1355_v12 }
 0x337   : > { %v1049_v46 = vadd.f32 %v1048_v41, %v1047_v30  ;;  %1137 = vmatpush.msrb.mxu3 %v1118_v43  ;;  %v2051_v2 = vpop.eup %2050  ;;  %v1370_v28 = vmax.f32 %v1355_v12, %v1366_v38  ;;  %v941_v30 = vor.u32 1.1754944e-38, %v940_v51  ;;  %v1732_v41 = vpop.f32.mrf.mxu0 }
 0x338   : > { %1972 = vmatmul.msk.f32.vlgmr.msrb.gmra.mxu3 %vm826_vm1, %v2448_v6  ;;  %v930_v5 = vmul.f32 %v2051_v2, %v928_v44  ;;  %vm935_vm3 = vweird.f32 %v2051_v2 }
 0x339   : > { %v1050_v62 = vadd.f32 %v1049_v46, %v2584_v40  ;;  %1999 = vmatpush.msra.mxu3 %v2488_v13  ;;  %vm936_vm5 = vmor %vm934_vm2, %vm935_vm3 }
 0x33a   : > { %v1357_v0 = vpop.f32.mrf.mxu1  ;;  %v931_v13 = vsub.f32 1.0, %v930_v5 }
 0x33b   : > { %v1051_v63 = vsub.f32 0.0, %v1050_v62  ;;  %2000 = vmatpush.msra.mxu3 %v2491_v19 }
 0x33c   : > { %v932_v9 = vmul.f32 %v2051_v2, %v931_v13 }
 0x33d   : > { %v1052_v1 = vmul.f32 1.442695, %v1051_v63  ;;  %2001 = vmatpush.msra.mxu3 %v2494_v21  ;;  %v1358_v21 = vadd.f32 %v1357_v0, %v2436_v54 }
 0x33e   : > { %v933_v31 = vadd.f32 %v2051_v2, %v932_v9 }
 0x33f   : > { %2052 = vpow2.f32 %v1052_v1  ;;  %2002 = vmatpush.msra.mxu3 %v2497_v25  ;;  %v1367_v20 = vmul.f32 0.01, %v1358_v21  ;;  %v1735_v44 = vpop.f32.mrf.mxu0 }
 0x340   : > { %1973 = vmatmul.msk.f32.gmra.mxu3 %vm826_vm1, %v2458_v16  ;;  %v937_v26 = vsel %vm936_vm5, %v2051_v2, %v933_v31  ;;  %v1736_v9 = vadd.f32 %v1735_v44, %v2436_v54 }
 0x341   : > { %v1371_v24 = vmax.f32 %v1358_v21, %v1367_v20  ;;  %v942_v34 = vsel %vm939_vm9, %v941_v30, %v937_v26 }
 0x342   : > { %v1360_v3 = vpop.f32.mrf.mxu1 }
 0x343   : > { %v1361_v19 = vadd.f32 %v1360_v3, %v2441_v60 }
 0x345   : > { %v2053_v4 = vpop.eup %2052  ;;  %v1368_v17 = vmul.f32 0.01, %v1361_v19 }
 0x346   : > { %v1054_v7 = vadd.f32 1.0, %v2053_v4 }
 0x347   : > { %v1372_v47 = vmax.f32 %v1361_v19, %v1368_v17  ;;  %v1738_v5 = vpop.f32.mrf.mxu0  ;;  %v1733_v17 = vadd.f32 %v1732_v41, %v2439_v59 }
 0x348   : > { %2054 = vrcp.f32 %v1054_v7  ;;  %1974 = vmatmul.msk.f32.gmra.mxu3 %vm826_vm1, %v2466_v49  ;;  %v1066_v52 = vand.u32 2147483648, %v1054_v7  ;;  %v1064_v56 = vand.u32 2147483647, %v1054_v7  ;;  %vm1060_vm6 = vweird.f32 %v1054_v7 }
 0x349   : > { %v1739_v19 = vadd.f32 %v1738_v5, %v2441_v60 }
 0x34a   : > { %v1363_v8 = vpop.f32.mrf.mxu1  ;;  %v1067_v33 = vor.u32 1.1754944e-38, %v1066_v52  ;;  %vm1065_vm10 = vcmp.eq.f32.partialorder %v1064_v56, 8.507059e+37 }
 0x34b   : > { %v1364_v25 = vadd.f32 %v1363_v8, %v2433_v50 }
 0x34d   : > { %v1369_v18 = vmul.f32 0.01, %v1364_v25 }
 0x34e   : > { %v2055_v11 = vpop.eup %2054 }
 0x34f   : > { %v1056_v15 = vmul.f32 %v2055_v11, %v1054_v7  ;;  %v1373_v29 = vmax.f32 %v1364_v25, %v1369_v18  ;;  %vm1061_vm4 = vweird.f32 %v2055_v11  ;;  %v1746_v18 = vmul.f32 0.01, %v1739_v19 }
 0x350   : > { %1975 = vmatmul.msk.f32.gmra.mxu3 %vm826_vm1, %v2475_v58  ;;  %vm1062_vm7 = vmor %vm1060_vm6, %vm1061_vm4  ;;  %vm1829_vm4 = vcmask 1042432  }
 0x351   : > { %v1057_v35 = vsub.f32 1.0, %v1056_v15  ;;  %1386 = vmatpush.msrb.mxu3 %v1373_v29  ;;  %v1745_v29 = vmul.f32 0.01, %v1736_v9 }
 0x352   : > { %v1606_v36 = vpop.f32.mrf.mxu1 }
 0x353   : > { %v1058_v55 = vmul.f32 %v2055_v11, %v1057_v35  ;;  %1387 = vmatpush.msrb.mxu3 %v1372_v47  ;;  %v1607_v2 = vadd.f32 %v1606_v36, %v2439_v59  ;;  %v1750_v35 = vmax.f32 %v1739_v19, %v1746_v18 }
 0x355   : > { %v1059_v27 = vadd.f32 %v2055_v11, %v1058_v55  ;;  %1388 = vmatpush.msrb.mxu3 %v1371_v24  ;;  %v1618_v8 = vmul.f32 0.01, %v1607_v2 }
 0x357   : > { %v1063_v22 = vsel %vm1062_vm7, %v2055_v11, %v1059_v27  ;;  %1389 = vmatpush.msrb.mxu3 %v1370_v28  ;;  %v1622_v15 = vmax.f32 %v1607_v2, %v1618_v8 }
 0x358   : > { %v1068_v37 = vsel %vm1065_vm10, %v1067_v33, %v1063_v22  ;;  %1979 = vmatmul.msk.f32.vlgmr.msra.gmra.mxu3 %vm826_vm1, %v2475_v58 }
 0x359   : > { %v2623_v39 = vsel %vm1825_vm8, %v942_v34, %v1068_v37 }
 0x35a   : > { %v1609_v43 = vpop.f32.mrf.mxu1 }
 0x35b   : > { %v1610_v0 = vadd.f32 %v1609_v43, %v2436_v54  ;;  %v1749_v54 = vmax.f32 %v1736_v9, %v1745_v29 }
 0x35d   : > { %v1619_v7 = vmul.f32 0.01, %v1610_v0 }
 0x35f   : > { %v1623_v11 = vmax.f32 %v1610_v0, %v1619_v7 }
 0x360   : > { %1980 = vmatmul.msk.f32.vlgmr.msrb.gmra.mxu3 %vm826_vm1, %v2448_v6 }
 0x362   : > { %v1612_v46 = vpop.f32.mrf.mxu1 }
 0x363   : > { %v1613_v62 = vadd.f32 %v1612_v46, %v2441_v60  ;;  %v1744_v60 = vmul.f32 0.01, %v1733_v17 }
 0x365   : > { %v1620_v3 = vmul.f32 0.01, %v1613_v62  ;;  %v1748_v38 = vmax.f32 %v1733_v17, %v1744_v60 }
 0x367   : > { %v1624_v21 = vmax.f32 %v1613_v62, %v1620_v3 }
 0x368   : > { %1981 = vmatmul.msk.f32.gmra.mxu3 %vm826_vm1, %v2458_v16 }
 0x36a   : > { %v1615_v63 = vpop.f32.mrf.mxu1 }
 0x36b   : > { %v1616_v1 = vadd.f32 %v1615_v63, %v2433_v50 }
 0x36d   : > { %v1621_v4 = vmul.f32 0.01, %v1616_v1 }
 0x36f   : > { %v1625_v13 = vmax.f32 %v1616_v1, %v1621_v4 }
 0x370   : > { %1982 = vmatmul.msk.f32.gmra.mxu3 %vm826_vm1, %v2466_v49 }
 0x371   : > { %1638 = vmatpush.msra.mxu3 %v1625_v13 }
 0x372   : > { %v1741_v25 = vpop.f32.mrf.mxu1 }
 0x373   : > { %v1742_v12 = vadd.f32 %v1741_v25, %v2433_v50  ;;  %1639 = vmatpush.msra.mxu3 %v1624_v21 }
 0x375   : > { %v1747_v20 = vmul.f32 0.01, %v1742_v12  ;;  %1640 = vmatpush.msra.mxu3 %v1623_v11 }
 0x377   : > { %v1751_v31 = vmax.f32 %v1742_v12, %v1747_v20  ;;  %1641 = vmatpush.msra.mxu3 %v1622_v15 }
 0x378   : > { %1983 = vmatmul.msk.f32.gmra.mxu3 %vm826_vm1, %v2475_v58 }
 0x379   : > { %1764 = vmatpush.msrb.mxu2 %v1751_v31 }
 0x37b   : > { %1765 = vmatpush.msrb.mxu2 %v1750_v35 }
 0x37d   : > { %1766 = vmatpush.msrb.mxu2 %v1749_v54 }
 0x37f   : > { %1767 = vmatpush.msrb.mxu2 %v1748_v38 }
 0x380   : > { %1988 = vmatmul.msk.f32.vlgmr.msra.gmra.mxu3 %vm826_vm1, %v2448_v6  ;;  %1992 = vmatmul.msk.f32.vlgmr.msrb.gmra.mxu2 %vm826_vm1, %v2448_v6  ;;  %v1271_v6 = vpop.f32.mrf.mxu2 }
 0x381   : > { %v1272_v33 = vadd.f32 %v1271_v6, %v2537_v61 }
 0x383   : > { %v1279_v43 = vmul.f32 0.01, %v1272_v33 }
 0x385   : > { %v1283_v0 = vmax.f32 %v1272_v33, %v1279_v43 }
 0x387   : > { %v1287_v4 = vmul.f32 %v1283_v0, %v2567_v45 }
 0x388   : > { %1989 = vmatmul.msk.f32.gmra.mxu3 %vm826_vm1, %v2458_v16  ;;  %1993 = vmatmul.msk.f32.gmra.mxu2 %vm826_vm1, %v2458_v16  ;;  %v1517_v55 = vpop.f32.mrf.mxu2 }
 0x389   : > { %v1292_v25 = vsel %vm343_vm0, %v1287_v4, 0.0  ;;  %v1518_v35 = vadd.f32 %v1517_v55, %v2522_v48 }
 0x38a   : > { %v1293_v17 = vadd.f32 %v1292_v25, %v2601_v42 }
 0x390   : > { %1990 = vmatmul.msk.f32.gmra.mxu3 %vm826_vm1, %v2466_v49  ;;  %1994 = vmatmul.msk.f32.gmra.mxu2 %vm826_vm1, %v2466_v49  ;;  %v1520_v34 = vpop.f32.mrf.mxu2 }
 0x391   : > { %v1521_v20 = vadd.f32 %v1520_v34, %v2527_v57 }
 0x393   : > { %v1530_v6 = vmul.f32 0.01, %v1521_v20 }
 0x398   : > { %1991 = vmatmul.msk.f32.gmra.mxu3 %vm826_vm1, %v2475_v58  ;;  %1995 = vmatmul.msk.f32.gmra.mxu2 %vm826_vm1, %v2475_v58  ;;  %v1523_v5 = vpop.f32.mrf.mxu2 }
 0x399   : > { %v1524_v38 = vadd.f32 %v1523_v5, %v2537_v61 }
 0x3a0   : > { %v1526_v54 = vpop.f32.mrf.mxu2 }
 0x3bb   : > { %v1139_v50 = vpop.f32.mrf.mxu3 }
 0x3bc   : > { %v1140_v59 = vadd.f32 %v1139_v50, %v2522_v48 }
 0x3be   : > { %v1151_v47 = vmul.f32 0.01, %v1140_v59 }
 0x3c0   : > { %v1155_v52 = vmax.f32 %v1140_v59, %v1151_v47  ;;  %v1527_v47 = vadd.f32 %v1526_v54, %v2546_v14 }
 0x3c2   : > { %v1159_v56 = vmul.f32 %v1155_v52, %v2554_v23  ;;  %v1529_v52 = vmul.f32 0.01, %v1518_v35 }
 0x3c3   : > { %v1142_v51 = vpop.f32.mrf.mxu3 }
 0x3c4   : > { %v1143_v16 = vadd.f32 %v1142_v51, %v2527_v57  ;;  %v1163_v26 = vsel %vm343_vm0, %v1159_v56, 0.0 }
 0x3c6   : > { %v1152_v53 = vmul.f32 0.01, %v1143_v16 }
 0x3c8   : > { %v1156_v49 = vmax.f32 %v1143_v16, %v1152_v53  ;;  %v1531_v16 = vmul.f32 0.01, %v1524_v38 }
 0x3ca   : > { %v1160_v24 = vmul.f32 %v1156_v49, %v2560_v32 }
 0x3cb   : > { %v1145_v36 = vpop.f32.mrf.mxu3 }
 0x3cc   : > { %v1164_v58 = vsel %vm343_vm0, %v1160_v24, 0.0  ;;  %v1146_v27 = vadd.f32 %v1145_v36, %v2537_v61  ;;  %v1534_v24 = vmax.f32 %v1521_v20, %v1530_v6  ;;  %v1532_v36 = vmul.f32 0.01, %v1527_v47 }
 0x3cd   : > { %v1165_v28 = vadd.f32 %v1164_v58, %v1163_v26  ;;  %v1533_v58 = vmax.f32 %v1518_v35, %v1529_v52 }
 0x3ce   : > { %v1153_v30 = vmul.f32 0.01, %v1146_v27  ;;  %v1536_v34 = vmax.f32 %v1527_v47, %v1532_v36 }
 0x3cf   : > { %v1537_v43 = vmul.f32 %v1533_v58, %v2554_v23 }
 0x3d0   : > { %v1157_v22 = vmax.f32 %v1146_v27, %v1153_v30  ;;  %v1535_v27 = vmax.f32 %v1524_v38, %v1531_v16 }
 0x3d2   : > { %v1161_v37 = vmul.f32 %v1157_v22, %v2567_v45  ;;  %v1538_v22 = vmul.f32 %v1534_v24, %v2560_v32 }
 0x3d3   : > { %v1148_v41 = vpop.f32.mrf.mxu3 }
 0x3d4   : > { %v1166_v46 = vsel %vm343_vm0, %v1161_v37, 0.0  ;;  %v1149_v44 = vadd.f32 %v1148_v41, %v2546_v14 }
 0x3d5   : > { %v1167_v62 = vadd.f32 %v1166_v46, %v1165_v28  ;;  %v1539_v46 = vmul.f32 %v1535_v27, %v2567_v45 }
 0x3d6   : > { %v1154_v63 = vmul.f32 0.01, %v1149_v44 }
 0x3d8   : > { %v1158_v1 = vmax.f32 %v1149_v44, %v1154_v63 }
 0x3da   : > { %v1162_v2 = vmul.f32 %v1158_v1, %v2573_v10  ;;  %v1542_v1 = vsel %vm343_vm0, %v1538_v22, 0.0 }
 0x3db   : > { %v1274_v3 = vpop.f32.mrf.mxu3 }
 0x3dc   : > { %v1168_v7 = vsel %vm343_vm0, %v1162_v2, 0.0  ;;  %v1275_v13 = vadd.f32 %v1274_v3, %v2546_v14  ;;  %v1540_v2 = vmul.f32 %v1536_v34, %v2573_v10 }
 0x3dd   : > { %v1169_v19 = vadd.f32 %v1168_v7, %v1167_v62 }
 0x3de   : > { %v1280_v8 = vmul.f32 0.01, %v1275_v13 }
 0x3df   : > { %v1170_v21 = vrot.slane %v1169_v19, 4 }
 0x3e0   : > { %v1284_v9 = vmax.f32 %v1275_v13, %v1280_v8  ;;  %v1541_v13 = vsel %vm343_vm0, %v1537_v43, 0.0 }
 0x3e1   : > { %v1171_v11 = vadd.f32 %v1170_v21, %v1169_v19  ;;  %v1544_v19 = vsel %vm343_vm0, %v1539_v46, 0.0  ;;  %v1543_v25 = vadd.f32 %v1542_v1, %v1541_v13 }
 0x3e2   : > { %v1288_v12 = vmul.f32 %v1284_v9, %v2573_v10 }
 0x3e3   : > { %v1172_v18 = vrot.slane %v1171_v11, 2  ;;  %v1391_v15 = vpop.f32.mrf.mxu3 }
 0x3e4   : > { %v1294_v29 = vsel %vm343_vm0, %v1288_v12, 0.0  ;;  %v1392_v41 = vadd.f32 %v1391_v15, %v2522_v48 }
 0x3e5   : > { %v1173_v31 = vadd.f32 %v1172_v18, %v1171_v11  ;;  %v1295_v60 = vadd.f32 %v1294_v29, %v1293_v17  ;;  %v1546_v11 = vsel %vm343_vm0, %v1540_v2, 0.0  ;;  %v1545_v18 = vadd.f32 %v1544_v19, %v1543_v25 }
 0x3e6   : > { %v1403_v4 = vmul.f32 0.01, %v1392_v41 }
 0x3e7   : > { %v1174_v50 = vrot.slane %v1173_v31, 1  ;;  %v1296_v59 = vrot.slane %v1295_v60, 4  ;;  %v1547_v20 = vadd.f32 %v1546_v11, %v1545_v18 }
 0x3e8   : > { %v1407_v12 = vmax.f32 %v1392_v41, %v1403_v4 }
 0x3e9   : > { %v1175_v51 = vadd.f32 %v1174_v50, %v1173_v31  ;;  %v1297_v42 = vadd.f32 %v1296_v59, %v1295_v60  ;;  %v1548_v6 = vrot.slane %v1547_v20, 4 }
 0x3ea   : > { %v1411_v31 = vmul.f32 %v1407_v12, %v2554_v23 }
 0x3eb   : > { %v1176_v53 = vadd.f32 %v1175_v51, %v2584_v40  ;;  %v1298_v56 = vrot.slane %v1297_v42, 2  ;;  %v1394_v49 = vpop.f32.mrf.mxu3  ;;  %v1549_v24 = vadd.f32 %v1548_v6, %v1547_v20 }
 0x3ec   : > { %v1395_v33 = vadd.f32 %v1394_v49, %v2527_v57  ;;  %v1415_v51 = vsel %vm343_vm0, %v1411_v31, 0.0 }
 0x3ed   : > { %v1177_v26 = vsub.f32 0.0, %v1176_v53  ;;  %v1299_v55 = vadd.f32 %v1298_v56, %v1297_v42  ;;  %v1550_v43 = vrot.slane %v1549_v24, 2 }
 0x3ee   : > { %v1404_v62 = vmul.f32 0.01, %v1395_v33 }
 0x3ef   : > { %v1178_v28 = vmul.f32 1.442695, %v1177_v26  ;;  %v1300_v30 = vrot.slane %v1299_v55, 1 }
 0x3f0   : > { %v1408_v21 = vmax.f32 %v1395_v33, %v1404_v62 }
 0x3f1   : > { %2056 = vpow2.f32 %v1178_v28  ;;  %v1301_v37 = vadd.f32 %v1300_v30, %v1299_v55 }
 0x3f2   : > { %v1412_v15 = vmul.f32 %v1408_v21, %v2560_v32 }
 0x3f3   : > { %v1302_v44 = vadd.f32 %v1301_v37, %v2584_v40  ;;  %v1397_v63 = vpop.f32.mrf.mxu3 }
 0x3f4   : > { %v1398_v0 = vadd.f32 %v1397_v63, %v2537_v61  ;;  %v1416_v38 = vsel %vm343_vm0, %v1412_v15, 0.0 }
 0x3f5   : > { %v1303_v3 = vsub.f32 0.0, %v1302_v44  ;;  %v1417_v53 = vadd.f32 %v1416_v38, %v1415_v51 }
 0x3f6   : > { %v1405_v5 = vmul.f32 0.01, %v1398_v0 }
 0x3f7   : > { %v2057_v7 = vpop.eup %2056  ;;  %v1304_v8 = vmul.f32 1.442695, %v1303_v3 }
 0x3f8   : > { %v1180_v9 = vadd.f32 1.0, %v2057_v7  ;;  %v1409_v17 = vmax.f32 %v1398_v0, %v1405_v5  ;;  %v1551_v5 = vadd.f32 %v1550_v43, %v1549_v24 }
 0x3f9   : > { %2058 = vpow2.f32 %v1304_v8 }
 0x3fa   : > { %2060 = vrcp.f32 %v1180_v9  ;;  %v1413_v60 = vmul.f32 %v1409_v17, %v2567_v45  ;;  %v1192_v58 = vand.u32 2147483648, %v1180_v9  ;;  %v1190_v30 = vand.u32 2147483647, %v1180_v9 }
 0x3fb   : > { %v1400_v29 = vpop.f32.mrf.mxu3  ;;  %vm1186_vm12 = vweird.f32 %v1180_v9  ;;  %v1552_v18 = vrot.slane %v1551_v5, 1 }
 0x3fc   : > { %v1401_v35 = vadd.f32 %v1400_v29, %v2546_v14  ;;  %v1418_v42 = vsel %vm343_vm0, %v1413_v60, 0.0  ;;  %v1193_v41 = vor.u32 1.1754944e-38, %v1192_v58  ;;  %vm1191_vm15 = vcmp.eq.f32.partialorder %v1190_v30, 8.507059e+37 }
 0x3fd   : > { %v1419_v36 = vadd.f32 %v1418_v42, %v1417_v53  ;;  %v1553_v6 = vadd.f32 %v1552_v18, %v1551_v5 }
 0x3fe   : > { %v1406_v50 = vmul.f32 0.01, %v1401_v35 }
 0x3ff   : > { %v2059_v54 = vpop.eup %2058 }
 0x400   : > { %v2061_v59 = vpop.eup %2060  ;;  %v1306_v47 = vadd.f32 1.0, %v2059_v54  ;;  %v1410_v52 = vmax.f32 %v1401_v35, %v1406_v50 }
 0x401   : > { %v1182_v16 = vmul.f32 %v2061_v59, %v1180_v9  ;;  %vm1187_vm11 = vweird.f32 %v2061_v59 }
 0x402   : > { %2062 = vrcp.f32 %v1306_v47  ;;  %v1414_v56 = vmul.f32 %v1410_v52, %v2573_v10  ;;  %vm1188_vm13 = vmor %vm1186_vm12, %vm1187_vm11  ;;  %v1318_v7 = vand.u32 2147483648, %v1306_v47  ;;  %v1316_v8 = vand.u32 2147483647, %v1306_v47 }
 0x403   : > { %v1183_v49 = vsub.f32 1.0, %v1182_v16  ;;  %v1643_v26 = vpop.f32.mrf.mxu3  ;;  %v1769_v55 = vpop.f32.mrf.mxu2  ;;  %vm1312_vm2 = vweird.f32 %v1306_v47 }
 0x404   : > { %v1420_v27 = vsel %vm343_vm0, %v1414_v56, 0.0  ;;  %v1644_v11 = vadd.f32 %v1643_v26, %v2522_v48  ;;  %v1770_v12 = vadd.f32 %v1769_v55, %v2522_v48  ;;  %v1319_v17 = vor.u32 1.1754944e-38, %v1318_v7 }
 0x405   : > { %v1184_v28 = vmul.f32 %v2061_v59, %v1183_v49  ;;  %v1421_v33 = vadd.f32 %v1420_v27, %v1419_v36  ;;  %vm1317_vm5 = vcmp.eq.f32.partialorder %v1316_v8, 8.507059e+37  ;;  %v1554_v36 = vadd.f32 %v1553_v6, %v2584_v40 }
 0x406   : > { %v1655_v35 = vmul.f32 0.01, %v1644_v11  ;;  %v1781_v54 = vmul.f32 0.01, %v1770_v12 }
 0x407   : > { %v1185_v22 = vadd.f32 %v2061_v59, %v1184_v28  ;;  %v1422_v37 = vrot.slane %v1421_v33, 4 }
 0x408   : > { %v2063_v34 = vpop.eup %2062  ;;  %v1659_v53 = vmax.f32 %v1644_v11, %v1655_v35  ;;  %v1785_v56 = vmax.f32 %v1770_v12, %v1781_v54 }
 0x409   : > { %v1189_v46 = vsel %vm1188_vm13, %v2061_v59, %v1185_v22  ;;  %v1308_v44 = vmul.f32 %v2063_v34, %v1306_v47  ;;  %v1423_v62 = vadd.f32 %v1422_v37, %v1421_v33  ;;  %vm1313_vm1 = vweird.f32 %v2063_v34 }
 0x40a   : > { %v1194_v63 = vsel %vm1191_vm15, %v1193_v41, %v1189_v46  ;;  %vm1314_vm3 = vmor %vm1312_vm2, %vm1313_vm1  ;;  %v1789_v27 = vmul.f32 %v1785_v56, %v2554_v23  ;;  %v1555_v41 = vsub.f32 0.0, %v1554_v36 }
 0x40b   : > { %v1309_v0 = vsub.f32 1.0, %v1308_v44  ;;  %v1828_v1 = vsel %vm1827_vm14, %v2623_v39, %v1194_v63  ;;  %v1424_v2 = vrot.slane %v1423_v62, 2  ;;  %v1646_v3 = vpop.f32.mrf.mxu3  ;;  %v1772_v4 = vpop.f32.mrf.mxu2  ;;  %vm1831_vm14 = vcmask 1043456  }
 0x40c   : > { %v1647_v21 = vadd.f32 %v1646_v3, %v2527_v57  ;;  %v1773_v25 = vadd.f32 %v1772_v4, %v2527_v57  ;;  %v1793_v63 = vsel %vm343_vm0, %v1789_v27, 0.0  ;;  %v1556_v3 = vmul.f32 1.442695, %v1555_v41 }
 0x40d   : > { %v1425_v13 = vadd.f32 %v1424_v2, %v1423_v62  ;;  %v1310_v19 = vmul.f32 %v2063_v34, %v1309_v0 }
 0x40e   : > { %v1656_v20 = vmul.f32 0.01, %v1647_v21  ;;  %v1782_v29 = vmul.f32 0.01, %v1773_v25 }
 0x40f   : > { %v1426_v9 = vrot.slane %v1425_v13, 1  ;;  %v1311_v39 = vadd.f32 %v2063_v34, %v1310_v19 }
 0x410   : > { %v1660_v47 = vmax.f32 %v1647_v21, %v1656_v20  ;;  %v1786_v51 = vmax.f32 %v1773_v25, %v1782_v29 }
 0x411   : > { %v1315_v15 = vsel %vm1314_vm3, %v2063_v34, %v1311_v39  ;;  %v1427_v60 = vadd.f32 %v1426_v9, %v1425_v13  ;;  %vm1833_vm3 = vcmask 1044480  }
 0x412   : > { %v1320_v31 = vsel %vm1317_vm5, %v1319_v17, %v1315_v15  ;;  %v1664_v26 = vmul.f32 %v1660_v47, %v2560_v32  ;;  %v1790_v55 = vmul.f32 %v1786_v51, %v2560_v32 }
 0x413   : > { %v1649_v57 = vpop.f32.mrf.mxu3  ;;  %v1775_v38 = vpop.f32.mrf.mxu2  ;;  %v2707_v50 = vsel %vm1829_vm4, %v1828_v1, %v1320_v31  ;;  %v1428_v16 = vadd.f32 %v1427_v60, %v2584_v40 }
 0x414   : > { %v1650_v59 = vadd.f32 %v1649_v57, %v2537_v61  ;;  %v1776_v48 = vadd.f32 %v1775_v38, %v2537_v61  ;;  %v1663_v61 = vmul.f32 %v1659_v53, %v2554_v23  ;;  %v1668_v43 = vsel %vm343_vm0, %v1664_v26, 0.0 }
 0x415   : > { %v1429_v58 = vsub.f32 0.0, %v1428_v16  ;;  %v1794_v32 = vsel %vm343_vm0, %v1790_v55, 0.0 }
 0x416   : > { %v1657_v42 = vmul.f32 0.01, %v1650_v59  ;;  %v1783_v52 = vmul.f32 0.01, %v1776_v48  ;;  %v1667_v23 = vsel %vm343_vm0, %v1663_v61, 0.0  ;;  %v1795_v4 = vadd.f32 %v1794_v32, %v1793_v63 }
 0x417   : > { %v1430_v62 = vmul.f32 1.442695, %v1429_v58 }
 0x418   : > { %v1661_v49 = vmax.f32 %v1650_v59, %v1657_v42  ;;  %v1787_v24 = vmax.f32 %v1776_v48, %v1783_v52 }
 0x419   : > { %2064 = vpow2.f32 %v1430_v62 }
 0x41a   : > { %v1665_v33 = vmul.f32 %v1661_v49, %v2567_v45  ;;  %v1791_v22 = vmul.f32 %v1787_v24, %v2567_v45  ;;  %2066 = vpow2.f32 %v1556_v3 }
 0x41b   : > { %v1652_v28 = vpop.f32.mrf.mxu3  ;;  %v1778_v30 = vpop.f32.mrf.mxu2 }
 0x41c   : > { %v1653_v34 = vadd.f32 %v1652_v28, %v2546_v14  ;;  %v1779_v37 = vadd.f32 %v1778_v30, %v2546_v14  ;;  %v1670_v0 = vsel %vm343_vm0, %v1665_v33, 0.0  ;;  %v1796_v45 = vsel %vm343_vm0, %v1791_v22, 0.0 }
 0x41d   : > { %v1669_v14 = vadd.f32 %v1668_v43, %v1667_v23  ;;  %v1797_v19 = vadd.f32 %v1796_v45, %v1795_v4 }
 0x41e   : > { %v1658_v46 = vmul.f32 0.01, %v1653_v34  ;;  %v1784_v44 = vmul.f32 0.01, %v1779_v37 }
 0x41f   : > { %v1671_v13 = vadd.f32 %v1670_v0, %v1669_v14  ;;  %v2065_v39 = vpop.eup %2064 }
 0x420   : > { %v1662_v1 = vmax.f32 %v1653_v34, %v1658_v46  ;;  %v1788_v2 = vmax.f32 %v1779_v37, %v1784_v44  ;;  %v2067_v15 = vpop.eup %2066  ;;  %v1432_v31 = vadd.f32 1.0, %v2065_v39 }
 0x421   : > { %v1558_v35 = vadd.f32 1.0, %v2067_v15 }
 0x422   : > { %v1666_v5 = vmul.f32 %v1662_v1, %v2573_v10  ;;  %v1792_v7 = vmul.f32 %v1788_v2, %v2573_v10  ;;  %2068 = vrcp.f32 %v1432_v31  ;;  %v1444_v30 = vand.u32 2147483648, %v1432_v31 }
 0x423   : > { %2070 = vrcp.f32 %v1558_v35  ;;  %v1568_v33 = vand.u32 2147483647, %v1558_v35  ;;  %v1570_v22 = vand.u32 2147483648, %v1558_v35  ;;  %vm1438_vm7 = vweird.f32 %v1432_v31 }
 0x424   : > { %v1672_v8 = vsel %vm343_vm0, %v1666_v5, 0.0  ;;  %v1798_v21 = vsel %vm343_vm0, %v1792_v7, 0.0  ;;  %v1442_v34 = vand.u32 2147483647, %v1432_v31  ;;  %vm1564_vm10 = vweird.f32 %v1558_v35 }
 0x425   : > { %v1673_v25 = vadd.f32 %v1672_v8, %v1671_v13  ;;  %v1799_v9 = vadd.f32 %v1798_v21, %v1797_v19  ;;  %v1445_v44 = vor.u32 1.1754944e-38, %v1444_v30  ;;  %vm1569_vm12 = vcmp.eq.f32.partialorder %v1568_v33, 8.507059e+37 }
 0x426   : > { %vm1443_vm13 = vcmp.eq.f32.partialorder %v1442_v34, 8.507059e+37  ;;  %v1571_v0 = vor.u32 1.1754944e-38, %v1570_v22 }
 0x427   : > { %v1674_v11 = vrot.slane %v1673_v25, 4  ;;  %v1800_v12 = vrot.slane %v1799_v9, 4 }
 0x428   : > { %v2069_v42 = vpop.eup %2068 }
 0x429   : > { %v1675_v17 = vadd.f32 %v1674_v11, %v1673_v25  ;;  %v1801_v18 = vadd.f32 %v1800_v12, %v1799_v9  ;;  %v2071_v53 = vpop.eup %2070  ;;  %v1434_v56 = vmul.f32 %v2069_v42, %v1432_v31  ;;  %vm1439_vm6 = vweird.f32 %v2069_v42 }
 0x42a   : > { %v1560_v49 = vmul.f32 %v2071_v53, %v1558_v35  ;;  %vm1565_vm8 = vweird.f32 %v2071_v53  ;;  %vm1440_vm9 = vmor %vm1438_vm7, %vm1439_vm6  ;;  %vm1835_vm6 = vcmask 1045504  }
 0x42b   : > { %v1676_v20 = vrot.slane %v1675_v17, 2  ;;  %v1802_v29 = vrot.slane %v1801_v18, 2  ;;  %v1435_v24 = vsub.f32 1.0, %v1434_v56  ;;  %vm2733_vm11 = vmor %vm1564_vm10, %vm1565_vm8 }
 0x42c   : > { %v1561_v26 = vsub.f32 1.0, %v1560_v49 }
 0x42d   : > { %v1677_v10 = vadd.f32 %v1676_v20, %v1675_v17  ;;  %v1803_v60 = vadd.f32 %v1802_v29, %v1801_v18  ;;  %v1436_v27 = vmul.f32 %v2069_v42, %v1435_v24 }
 0x42f   : > { %v1678_v54 = vrot.slane %v1677_v10, 1  ;;  %v1804_v57 = vrot.slane %v1803_v60, 1  ;;  %v1437_v28 = vadd.f32 %v2069_v42, %v1436_v27 }
 0x431   : > { %v1679_v38 = vadd.f32 %v1678_v54, %v1677_v10  ;;  %v1805_v59 = vadd.f32 %v1804_v57, %v1803_v60  ;;  %v1441_v32 = vsel %vm1440_vm9, %v2069_v42, %v1437_v28  ;;  %vm1837_vm9 = vcmask 1046528  }
 0x432   : > { %v1446_v1 = vsel %vm1443_vm13, %v1445_v44, %v1441_v32 }
 0x433   : > { %v1680_v48 = vadd.f32 %v1679_v38, %v2584_v40  ;;  %v1806_v6 = vadd.f32 %v1805_v59, %v2584_v40  ;;  %v1562_v40 = vmul.f32 %v2071_v53, %v1561_v26  ;;  %v1832_v21 = vsel %vm1831_vm14, %v2707_v50, %v1446_v1 }
 0x435   : > { %v1681_v47 = vsub.f32 0.0, %v1680_v48  ;;  %v1807_v51 = vsub.f32 0.0, %v1806_v6  ;;  %v1563_v37 = vadd.f32 %v2071_v53, %v1562_v40 }
 0x437   : > { %v1682_v52 = vmul.f32 1.442695, %v1681_v47  ;;  %v1808_v16 = vmul.f32 1.442695, %v1807_v51  ;;  %v1567_v63 = vsel %vm2733_vm11, %v2071_v53, %v1563_v37 }
 0x438   : > { %v1572_v7 = vsel %vm1569_vm12, %v1571_v0, %v1567_v63 }
 0x439   : > { %2072 = vpow2.f32 %v1682_v52  ;;  %v1834_v18 = vsel %vm1833_vm3, %v1832_v21, %v1572_v7 }
 0x43a   : > { %2074 = vpow2.f32 %v1808_v16 }
 0x43f   : > { %v2073_v36 = vpop.eup %2072 }
 0x440   : > { %v2075_v55 = vpop.eup %2074  ;;  %v1684_v58 = vadd.f32 1.0, %v2073_v36 }
 0x441   : > { %v1810_v61 = vadd.f32 1.0, %v2075_v55 }
 0x442   : > { %2076 = vrcp.f32 %v1684_v58  ;;  %v1696_v2 = vand.u32 2147483648, %v1684_v58  ;;  %v1694_v4 = vand.u32 2147483647, %v1684_v58  ;;  %vm1690_vm2 = vweird.f32 %v1684_v58 }
 0x443   : > { %2078 = vrcp.f32 %v1810_v61  ;;  %v1822_v5 = vand.u32 2147483648, %v1810_v61  ;;  %v1820_v19 = vand.u32 2147483647, %v1810_v61  ;;  %vm1816_vm5 = vweird.f32 %v1810_v61 }
 0x444   : > { %v1697_v25 = vor.u32 1.1754944e-38, %v1696_v2  ;;  %vm1695_vm7 = vcmp.eq.f32.partialorder %v1694_v4, 8.507059e+37 }
 0x445   : > { %v1823_v12 = vor.u32 1.1754944e-38, %v1822_v5  ;;  %vm1821_vm10 = vcmp.eq.f32.partialorder %v1820_v19, 8.507059e+37 }
 0x448   : > { %v2077_v41 = vpop.eup %2076 }
 0x449   : > { %v2079_v43 = vpop.eup %2078  ;;  %v1686_v46 = vmul.f32 %v2077_v41, %v1684_v58  ;;  %vm1691_vm15 = vweird.f32 %v2077_v41 }
 0x44a   : > { %v1812_v23 = vmul.f32 %v2079_v43, %v1810_v61  ;;  %vm1817_vm1 = vweird.f32 %v2079_v43  ;;  %vm1692_vm4 = vmor %vm1690_vm2, %vm1691_vm15 }
 0x44b   : > { %v1687_v45 = vsub.f32 1.0, %v1686_v46  ;;  %vm1818_vm8 = vmor %vm1816_vm5, %vm1817_vm1 }
 0x44c   : > { %v1813_v3 = vsub.f32 1.0, %v1812_v23 }
 0x44d   : > { %v1688_v14 = vmul.f32 %v2077_v41, %v1687_v45 }
 0x44e   : > { %v1814_v13 = vmul.f32 %v2079_v43, %v1813_v3 }
 0x44f   : > { %v1689_v8 = vadd.f32 %v2077_v41, %v1688_v14 }
 0x450   : > { %v1815_v9 = vadd.f32 %v2079_v43, %v1814_v13 }
 0x451   : > { %v1693_v11 = vsel %vm1692_vm4, %v2077_v41, %v1689_v8 }
 0x452   : > { %v1698_v39 = vsel %vm1695_vm7, %v1697_v25, %v1693_v11  ;;  %v1819_v17 = vsel %vm1818_vm8, %v2079_v43, %v1815_v9 }
 0x453   : > { %v1824_v15 = vsel %vm1821_vm10, %v1823_v12, %v1819_v17  ;;  %v1836_v20 = vsel %vm1835_vm6, %v1834_v18, %v1698_v39 }
 0x454   : > { %v1838_v29 = vsel %vm1837_vm9, %v1836_v20, %v1824_v15 }
 0x455   : > { %1839 = vxpose.xlu2.b32.start.end [1/1] (short) (narrow) %v1838_v29, 8 }
 0x4ee   : > { %v1855_v50 = vpop.trf.xlu2 }
 0x4ef   : > { %1871 = vst.msk [vmem:[%s309_s13] sm:$0xff] %vm343_vm0, %v1855_v50 }
 0x4f0 PF: > { %s19_s28 = sadd.s32 1, %s2102_s28   ;;  %s2764_s26 = smov %s2098_s27 }
 0x4f1   : > { %p16_p5 = scmp.ge.s32.totalorder %s19_s28, 4   ;;  %s2765_s27 = smov %s2767_s6 }
 0x4f3   :  { %18 = sbr.rel (!%p16_p5) target bundleno = 3 (0x3), region = 92 }

</bundles_post_ra>
